<compile_context>
chip_gen: v5e
topology: v5e:2x2
jax: 0.10.0
libtpu: 0.0.40
codegen_flags: <defaults>
</compile_context>

<pallas_src>
import numpy as np
import jax
import jax.numpy as jnp
from jax.experimental import pallas as pl
from jax.experimental.pallas import tpu as pltpu


# ---------------------------------------------------------------------------
# Encoder parameter construction (deterministic, mirrors the PyTorch __init__)
# ---------------------------------------------------------------------------
def make_encoder_params(key, input_height, in_chans, out_chans, latent_dim,
                        add_final_conv):
    assert input_height % 16 == 0, 'input_height has to be a multiple of 16'
    params = []
    k1, key = jax.random.split(key)
    params.append(dict(
        kind="conv_lrelu",
        w=0.05 * jax.random.normal(k1, (out_chans, in_chans, 4, 4), jnp.float32)))
    h = input_height // 2
    c = out_chans
    while h > 4:
        kw, kg, kb, km, kv, key = jax.random.split(key, 6)
        cin, cout = c, c * 2
        params.append(dict(
            kind="conv_bn_lrelu",
            w=0.05 * jax.random.normal(kw, (cout, cin, 4, 4), jnp.float32),
            gamma=1.0 + 0.1 * jax.random.normal(kg, (cout,), jnp.float32),
            beta=0.1 * jax.random.normal(kb, (cout,), jnp.float32),
            mean=0.1 * jax.random.normal(km, (cout,), jnp.float32),
            var=1.0 + 0.1 * jnp.abs(jax.random.normal(kv, (cout,), jnp.float32)),
        ))
        c = cout
        h //= 2
    if add_final_conv:
        kf, key = jax.random.split(key)
        params.append(dict(
            kind="final_conv",
            w=0.05 * jax.random.normal(kf, (latent_dim, c, 4, 4), jnp.float32)))
    return params


# ---------------------------------------------------------------------------
# Prep: true conv weights as small bf16 matmul matrices (+ folded BN)
# ---------------------------------------------------------------------------
def prepare_kernel_weights(params, eps=1e-5):
    assert len(params) == 3, "specialised to the input_height==16 pyramid"
    assert params[0]["kind"] == "conv_lrelu"
    assert params[1]["kind"] == "conv_bn_lrelu"
    assert params[2]["kind"] == "final_conv"
    w1 = params[0]["w"]                         # (c1, c0, 4, 4)
    p2 = params[1]
    w3 = params[2]["w"]                         # (latent, c2, 4, 4)
    c1, c0 = int(w1.shape[0]), int(w1.shape[1])
    c2 = int(p2["w"].shape[0])
    latent = int(w3.shape[0])

    # (Cout, Cin, Ky, Kx) -> rows (ky, kx, cin), cols cout
    w1m = jnp.transpose(w1, (2, 3, 1, 0)).reshape(16 * c0, c1)
    w2m = jnp.transpose(p2["w"], (2, 3, 1, 0)).reshape(16 * c1, c2)
    w3m = jnp.transpose(w3, (2, 3, 1, 0)).reshape(16 * c2, latent)

    inv = 1.0 / jnp.sqrt(p2["var"] + eps)
    scale = p2["gamma"] * inv
    shift = p2["beta"] - p2["mean"] * scale
    w2m = w2m * scale[None, :]                  # fold BN scale into conv2 cols

    return dict(
        w1=w1m.astype(jnp.bfloat16),
        w2=w2m.astype(jnp.bfloat16),
        w3=w3m.astype(jnp.bfloat16),
        shift=shift.reshape(1, c2).astype(jnp.float32),
        dims=dict(c0=c0, c1=c1, c2=c2, latent=latent))


# ---------------------------------------------------------------------------
# Compile-time im2col index table (NCHW-flat addressing, both paddings folded)
# ---------------------------------------------------------------------------
def _layer1_patch_indices(batch, H, C):
    """Rows ordered (ky, kx, OY, OX, n); cols ordered (k1y, k1x, c0).

    (ky,kx)  : conv2 kernel tap          (OY,OX) : conv2 output position
    (k1y,k1x): conv1 kernel tap          c0      : input channel
    Out-of-range positions (zero padding of conv1 OR conv2) get an
    out-of-bounds sentinel index -> gather fills 0.
    """
    assert H == 16, "index table specialised to input_height == 16"
    H1, H2, K = H // 2, H // 4, 4
    ky, kx, OY, OX, n, k1y, k1x, c0 = np.ix_(
        np.arange(K), np.arange(K), np.arange(H2), np.arange(H2),
        np.arange(batch), np.arange(K), np.arange(K), np.arange(C))
    iy = 2 * OY - 1 + ky                    # conv1 output coords feeding conv2
    ix = 2 * OX - 1 + kx
    yy = 2 * iy - 1 + k1y                   # input coords feeding conv1
    xx = 2 * ix - 1 + k1x
    valid = ((iy >= 0) & (iy < H1) & (ix >= 0) & (ix < H1) &
             (yy >= 0) & (yy < H) & (xx >= 0) & (xx < H))
    flat = ((n * C + c0) * H + np.clip(yy, 0, H - 1)) * H + np.clip(xx, 0, H - 1)
    sentinel = batch * C * H * H            # out of bounds -> fill_value (0)
    idx = np.where(valid, flat, sentinel).astype(np.int32)
    return idx.reshape(K * K * H2 * H2 * batch, K * K * C)


# ---------------------------------------------------------------------------
# Pallas kernel: whole encoder, true weights, no reshapes, f32 accumulation
# ---------------------------------------------------------------------------
def _make_encoder_kernel(batch, c1, c2, latent, neg_slope):
    n_taps = 16                 # 4x4 conv2 kernel taps
    n_pos = 16                  # 4x4 conv3 spatial positions
    m2 = n_pos * batch          # conv2 output rows, ordered (position, image)

    def kernel(p1_ref, w1_ref, w2_ref, w3_ref, shift_ref, o_ref):
        # ---- conv1: one im2col matmul over all (tap, position, image) rows
        z1 = jnp.dot(p1_ref[...], w1_ref[...],
                     preferred_element_type=jnp.float32)
        a1 = jnp.where(z1 >= 0.0, z1, neg_slope * z1).astype(jnp.bfloat16)

        # ---- conv2: accumulate the 16 kernel taps (aligned 32-row blocks)
        acc2 = jnp.dot(a1[0:m2, :], w2_ref[0:c1, :],
                       preferred_element_type=jnp.float32)
        for k in range(1, n_taps):
            acc2 = acc2 + jnp.dot(a1[k * m2:(k + 1) * m2, :],
                                  w2_ref[k * c1:(k + 1) * c1, :],
                                  preferred_element_type=jnp.float32)
        z2 = acc2 + shift_ref[...]          # BN shift (scale folded into w2)
        a2 = jnp.where(z2 >= 0.0, z2, neg_slope * z2).astype(jnp.bfloat16)

        # ---- conv3 (4x4 -> 1x1): accumulate the 16 spatial positions
        acc3 = jnp.dot(a2[0:batch, :], w3_ref[0:c2, :],
                       preferred_element_type=jnp.float32)
        for p in range(1, n_pos):
            acc3 = acc3 + jnp.dot(a2[p * batch:(p + 1) * batch, :],
                                  w3_ref[p * c2:(p + 1) * c2, :],
                                  preferred_element_type=jnp.float32)
        o_ref[...] = acc3

    return kernel


def build_encoder_forward(kernel_weights, input_height, neg_slope=0.2):
    assert input_height == 16
    dims = kernel_weights["dims"]
    c0, c1, c2, latent = dims["c0"], dims["c1"], dims["c2"], dims["latent"]
    w1 = kernel_weights["w1"]
    w2 = kernel_weights["w2"]
    w3 = kernel_weights["w3"]
    shift = kernel_weights["shift"]
    H = input_height

    @jax.jit
    def forward(x_nchw):
        n = x_nchw.shape[0]
        assert x_nchw.shape == (n, c0, H, H)
        # One fused gather builds the (conv2-tap-duplicated) conv1 im2col
        # straight from the NCHW-flat input.  It subsumes the old NCHW->NHWC
        # transpose, both zero paddings and the im2col layout, so the wrapper
        # still issues a single glue op while the kernel's HBM weight traffic
        # drops from ~1.27 MiB of dense zeros to ~21 KiB of true weights.
        idx = _layer1_patch_indices(n, H, c0)                  # trace-time np
        x_flat = x_nchw.reshape(-1)
        patches = jnp.take(x_flat, jnp.asarray(idx), mode="fill",
                           fill_value=0.0).astype(jnp.bfloat16)  # (16*16*n, 64)

        kernel = _make_encoder_kernel(n, c1, c2, latent, neg_slope)
        vmem = pl.BlockSpec(memory_space=pltpu.MemorySpace.VMEM)
        out = pl.pallas_call(
            kernel,
            out_shape=jax.ShapeDtypeStruct((n, latent), jnp.float32),
            in_specs=[vmem, vmem, vmem, vmem, vmem],
            out_specs=vmem,
        )(patches, w1, w2, w3, shift)
        # output spatial is 1x1, so this is a pure (free) reshape to NCHW
        return out.reshape(n, latent, 1, 1)

    return forward


# ---------------------------------------------------------------------------
# Pure-JAX f32 reference (independent path, for correctness check)
# ---------------------------------------------------------------------------
def _conv_ref(x_nhwc, w_oihw, stride, pad):
    return jax.lax.conv_general_dilated(
        x_nhwc, jnp.transpose(w_oihw, (2, 3, 1, 0)),
        window_strides=(stride, stride),
        padding=((pad, pad), (pad, pad)),
        dimension_numbers=("NHWC", "HWIO", "NHWC"),
        precision=jax.lax.Precision.HIGHEST)


def encoder_reference(params, x_nchw):
    eps = 1e-5
    x = jnp.transpose(x_nchw, (0, 2, 3, 1))
    for p in params:
        if p["kind"] == "conv_lrelu":
            y = _conv_ref(x, p["w"], 2, 1)
            x = jnp.where(y >= 0, y, 0.2 * y)
        elif p["kind"] == "conv_bn_lrelu":
            y = _conv_ref(x, p["w"], 2, 1)
            inv = 1.0 / jnp.sqrt(p["var"] + eps)
            y = (y - p["mean"]) * inv * p["gamma"] + p["beta"]
            x = jnp.where(y >= 0, y, 0.2 * y)
        else:
            x = _conv_ref(x, p["w"], 1, 0)
    return jnp.transpose(x, (0, 3, 1, 2))


if __name__ == "__main__":
    key = jax.random.PRNGKey(0)
    k_params, k_x = jax.random.split(key)

    input_height, in_chans, out_chans, latent_dim = 16, 4, 8, 32
    batch = 2

    params = make_encoder_params(k_params, input_height, in_chans, out_chans,
                                 latent_dim, add_final_conv=True)
    kernel_weights = prepare_kernel_weights(params)
    forward = build_encoder_forward(kernel_weights, input_height)

    x = jax.random.normal(k_x, (batch, in_chans, input_height, input_height),
                          jnp.float32)

    out = jax.block_until_ready(forward(x))
    ref = jax.block_until_ready(encoder_reference(params, x))

    assert out.shape == (batch, latent_dim, 1, 1), out.shape
    # bf16 MXU operands (f32 accumulation) -> 5e-3 tolerance vs full-f32 ref.
    max_err = float(jnp.max(jnp.abs(out - ref)))
    assert jnp.allclose(out, ref, atol=5e-3, rtol=5e-3), max_err

    print("KERNEL_OK")
</pallas_src>

<mosaic_0001>
module attributes {stable_mosaic.version = 11 : i64} {
  func.func @kernel(%arg0: memref<512x64xbf16, #tpu.memory_space<vmem>>, %arg1: memref<64x8xbf16, #tpu.memory_space<vmem>>, %arg2: memref<128x16xbf16, #tpu.memory_space<vmem>>, %arg3: memref<256x32xbf16, #tpu.memory_space<vmem>>, %arg4: memref<1x16xf32, #tpu.memory_space<vmem>>, %arg5: memref<2x32xf32, #tpu.memory_space<vmem>>) attributes {dimension_semantics = [], scalar_prefetch = 0 : i64, scratch_operands = 0 : i64, tpu.core_type = #tpu.core_type<tc>} {
    %c0 = arith.constant 0 : index
    %c0_0 = arith.constant 0 : index
    %0 = vector.load %arg0[%c0, %c0_0] : memref<512x64xbf16, #tpu.memory_space<vmem>>, vector<512x64xbf16>
    %c0_1 = arith.constant 0 : index
    %c0_2 = arith.constant 0 : index
    %1 = vector.load %arg1[%c0_1, %c0_2] : memref<64x8xbf16, #tpu.memory_space<vmem>>, vector<64x8xbf16>
    %cst = arith.constant dense<0.000000e+00> : vector<512x8xf32>
    %2 = tpu.matmul %0, %1, %cst {dimension_numbers = #tpu.dot_dimension_numbers<[1], [0], [0], [1], [0, 0, 1, 1], [], []>} : vector<512x64xbf16>, vector<64x8xbf16>, vector<512x8xf32> -> vector<512x8xf32>
    %cst_3 = arith.constant 0.000000e+00 : f32
    %3 = vector.broadcast %cst_3 : f32 to vector<512x8xf32>
    %4 = arith.cmpf oge, %2, %3 : vector<512x8xf32>
    %cst_4 = arith.constant 2.000000e-01 : f32
    %5 = vector.broadcast %cst_4 : f32 to vector<512x8xf32>
    %6 = arith.mulf %5, %2 : vector<512x8xf32>
    %7 = arith.select %4, %2, %6 : vector<512x8xi1>, vector<512x8xf32>
    %8 = arith.truncf %7 : vector<512x8xf32> to vector<512x8xbf16>
    %9 = vector.extract_strided_slice %8 {offsets = [0, 0], sizes = [32, 8], strides = [1, 1]} : vector<512x8xbf16> to vector<32x8xbf16>
    %c0_5 = arith.constant 0 : index
    %c0_6 = arith.constant 0 : index
    %10 = vector.load %arg2[%c0_5, %c0_6] : memref<128x16xbf16, #tpu.memory_space<vmem>>, vector<8x16xbf16>
    %cst_7 = arith.constant dense<0.000000e+00> : vector<32x16xf32>
    %11 = tpu.matmul %9, %10, %cst_7 {dimension_numbers = #tpu.dot_dimension_numbers<[1], [0], [0], [1], [0, 0, 1, 1], [], []>} : vector<32x8xbf16>, vector<8x16xbf16>, vector<32x16xf32> -> vector<32x16xf32>
    %12 = vector.extract_strided_slice %8 {offsets = [32, 0], sizes = [32, 8], strides = [1, 1]} : vector<512x8xbf16> to vector<32x8xbf16>
    %c8 = arith.constant 8 : index
    %c0_8 = arith.constant 0 : index
    %13 = vector.load %arg2[%c8, %c0_8] : memref<128x16xbf16, #tpu.memory_space<vmem>>, vector<8x16xbf16>
    %cst_9 = arith.constant dense<0.000000e+00> : vector<32x16xf32>
    %14 = tpu.matmul %12, %13, %cst_9 {dimension_numbers = #tpu.dot_dimension_numbers<[1], [0], [0], [1], [0, 0, 1, 1], [], []>} : vector<32x8xbf16>, vector<8x16xbf16>, vector<32x16xf32> -> vector<32x16xf32>
    %15 = arith.addf %11, %14 : vector<32x16xf32>
    %16 = vector.extract_strided_slice %8 {offsets = [64, 0], sizes = [32, 8], strides = [1, 1]} : vector<512x8xbf16> to vector<32x8xbf16>
    %c16 = arith.constant 16 : index
    %c0_10 = arith.constant 0 : index
    %17 = vector.load %arg2[%c16, %c0_10] : memref<128x16xbf16, #tpu.memory_space<vmem>>, vector<8x16xbf16>
    %cst_11 = arith.constant dense<0.000000e+00> : vector<32x16xf32>
    %18 = tpu.matmul %16, %17, %cst_11 {dimension_numbers = #tpu.dot_dimension_numbers<[1], [0], [0], [1], [0, 0, 1, 1], [], []>} : vector<32x8xbf16>, vector<8x16xbf16>, vector<32x16xf32> -> vector<32x16xf32>
    %19 = arith.addf %15, %18 : vector<32x16xf32>
    %20 = vector.extract_strided_slice %8 {offsets = [96, 0], sizes = [32, 8], strides = [1, 1]} : vector<512x8xbf16> to vector<32x8xbf16>
    %c24 = arith.constant 24 : index
    %c0_12 = arith.constant 0 : index
    %21 = vector.load %arg2[%c24, %c0_12] : memref<128x16xbf16, #tpu.memory_space<vmem>>, vector<8x16xbf16>
    %cst_13 = arith.constant dense<0.000000e+00> : vector<32x16xf32>
    %22 = tpu.matmul %20, %21, %cst_13 {dimension_numbers = #tpu.dot_dimension_numbers<[1], [0], [0], [1], [0, 0, 1, 1], [], []>} : vector<32x8xbf16>, vector<8x16xbf16>, vector<32x16xf32> -> vector<32x16xf32>
    %23 = arith.addf %19, %22 : vector<32x16xf32>
    %24 = vector.extract_strided_slice %8 {offsets = [128, 0], sizes = [32, 8], strides = [1, 1]} : vector<512x8xbf16> to vector<32x8xbf16>
    %c32 = arith.constant 32 : index
    %c0_14 = arith.constant 0 : index
    %25 = vector.load %arg2[%c32, %c0_14] : memref<128x16xbf16, #tpu.memory_space<vmem>>, vector<8x16xbf16>
    %cst_15 = arith.constant dense<0.000000e+00> : vector<32x16xf32>
    %26 = tpu.matmul %24, %25, %cst_15 {dimension_numbers = #tpu.dot_dimension_numbers<[1], [0], [0], [1], [0, 0, 1, 1], [], []>} : vector<32x8xbf16>, vector<8x16xbf16>, vector<32x16xf32> -> vector<32x16xf32>
    %27 = arith.addf %23, %26 : vector<32x16xf32>
    %28 = vector.extract_strided_slice %8 {offsets = [160, 0], sizes = [32, 8], strides = [1, 1]} : vector<512x8xbf16> to vector<32x8xbf16>
    %c40 = arith.constant 40 : index
    %c0_16 = arith.constant 0 : index
    %29 = vector.load %arg2[%c40, %c0_16] : memref<128x16xbf16, #tpu.memory_space<vmem>>, vector<8x16xbf16>
    %cst_17 = arith.constant dense<0.000000e+00> : vector<32x16xf32>
    %30 = tpu.matmul %28, %29, %cst_17 {dimension_numbers = #tpu.dot_dimension_numbers<[1], [0], [0], [1], [0, 0, 1, 1], [], []>} : vector<32x8xbf16>, vector<8x16xbf16>, vector<32x16xf32> -> vector<32x16xf32>
    %31 = arith.addf %27, %30 : vector<32x16xf32>
    %32 = vector.extract_strided_slice %8 {offsets = [192, 0], sizes = [32, 8], strides = [1, 1]} : vector<512x8xbf16> to vector<32x8xbf16>
    %c48 = arith.constant 48 : index
    %c0_18 = arith.constant 0 : index
    %33 = vector.load %arg2[%c48, %c0_18] : memref<128x16xbf16, #tpu.memory_space<vmem>>, vector<8x16xbf16>
    %cst_19 = arith.constant dense<0.000000e+00> : vector<32x16xf32>
    %34 = tpu.matmul %32, %33, %cst_19 {dimension_numbers = #tpu.dot_dimension_numbers<[1], [0], [0], [1], [0, 0, 1, 1], [], []>} : vector<32x8xbf16>, vector<8x16xbf16>, vector<32x16xf32> -> vector<32x16xf32>
    %35 = arith.addf %31, %34 : vector<32x16xf32>
    %36 = vector.extract_strided_slice %8 {offsets = [224, 0], sizes = [32, 8], strides = [1, 1]} : vector<512x8xbf16> to vector<32x8xbf16>
    %c56 = arith.constant 56 : index
    %c0_20 = arith.constant 0 : index
    %37 = vector.load %arg2[%c56, %c0_20] : memref<128x16xbf16, #tpu.memory_space<vmem>>, vector<8x16xbf16>
    %cst_21 = arith.constant dense<0.000000e+00> : vector<32x16xf32>
    %38 = tpu.matmul %36, %37, %cst_21 {dimension_numbers = #tpu.dot_dimension_numbers<[1], [0], [0], [1], [0, 0, 1, 1], [], []>} : vector<32x8xbf16>, vector<8x16xbf16>, vector<32x16xf32> -> vector<32x16xf32>
    %39 = arith.addf %35, %38 : vector<32x16xf32>
    %40 = vector.extract_strided_slice %8 {offsets = [256, 0], sizes = [32, 8], strides = [1, 1]} : vector<512x8xbf16> to vector<32x8xbf16>
    %c64 = arith.constant 64 : index
    %c0_22 = arith.constant 0 : index
    %41 = vector.load %arg2[%c64, %c0_22] : memref<128x16xbf16, #tpu.memory_space<vmem>>, vector<8x16xbf16>
    %cst_23 = arith.constant dense<0.000000e+00> : vector<32x16xf32>
    %42 = tpu.matmul %40, %41, %cst_23 {dimension_numbers = #tpu.dot_dimension_numbers<[1], [0], [0], [1], [0, 0, 1, 1], [], []>} : vector<32x8xbf16>, vector<8x16xbf16>, vector<32x16xf32> -> vector<32x16xf32>
    %43 = arith.addf %39, %42 : vector<32x16xf32>
    %44 = vector.extract_strided_slice %8 {offsets = [288, 0], sizes = [32, 8], strides = [1, 1]} : vector<512x8xbf16> to vector<32x8xbf16>
    %c72 = arith.constant 72 : index
    %c0_24 = arith.constant 0 : index
    %45 = vector.load %arg2[%c72, %c0_24] : memref<128x16xbf16, #tpu.memory_space<vmem>>, vector<8x16xbf16>
    %cst_25 = arith.constant dense<0.000000e+00> : vector<32x16xf32>
    %46 = tpu.matmul %44, %45, %cst_25 {dimension_numbers = #tpu.dot_dimension_numbers<[1], [0], [0], [1], [0, 0, 1, 1], [], []>} : vector<32x8xbf16>, vector<8x16xbf16>, vector<32x16xf32> -> vector<32x16xf32>
    %47 = arith.addf %43, %46 : vector<32x16xf32>
    %48 = vector.extract_strided_slice %8 {offsets = [320, 0], sizes = [32, 8], strides = [1, 1]} : vector<512x8xbf16> to vector<32x8xbf16>
    %c80 = arith.constant 80 : index
    %c0_26 = arith.constant 0 : index
    %49 = vector.load %arg2[%c80, %c0_26] : memref<128x16xbf16, #tpu.memory_space<vmem>>, vector<8x16xbf16>
    %cst_27 = arith.constant dense<0.000000e+00> : vector<32x16xf32>
    %50 = tpu.matmul %48, %49, %cst_27 {dimension_numbers = #tpu.dot_dimension_numbers<[1], [0], [0], [1], [0, 0, 1, 1], [], []>} : vector<32x8xbf16>, vector<8x16xbf16>, vector<32x16xf32> -> vector<32x16xf32>
    %51 = arith.addf %47, %50 : vector<32x16xf32>
    %52 = vector.extract_strided_slice %8 {offsets = [352, 0], sizes = [32, 8], strides = [1, 1]} : vector<512x8xbf16> to vector<32x8xbf16>
    %c88 = arith.constant 88 : index
    %c0_28 = arith.constant 0 : index
    %53 = vector.load %arg2[%c88, %c0_28] : memref<128x16xbf16, #tpu.memory_space<vmem>>, vector<8x16xbf16>
    %cst_29 = arith.constant dense<0.000000e+00> : vector<32x16xf32>
    %54 = tpu.matmul %52, %53, %cst_29 {dimension_numbers = #tpu.dot_dimension_numbers<[1], [0], [0], [1], [0, 0, 1, 1], [], []>} : vector<32x8xbf16>, vector<8x16xbf16>, vector<32x16xf32> -> vector<32x16xf32>
    %55 = arith.addf %51, %54 : vector<32x16xf32>
    %56 = vector.extract_strided_slice %8 {offsets = [384, 0], sizes = [32, 8], strides = [1, 1]} : vector<512x8xbf16> to vector<32x8xbf16>
    %c96 = arith.constant 96 : index
    %c0_30 = arith.constant 0 : index
    %57 = vector.load %arg2[%c96, %c0_30] : memref<128x16xbf16, #tpu.memory_space<vmem>>, vector<8x16xbf16>
    %cst_31 = arith.constant dense<0.000000e+00> : vector<32x16xf32>
    %58 = tpu.matmul %56, %57, %cst_31 {dimension_numbers = #tpu.dot_dimension_numbers<[1], [0], [0], [1], [0, 0, 1, 1], [], []>} : vector<32x8xbf16>, vector<8x16xbf16>, vector<32x16xf32> -> vector<32x16xf32>
    %59 = arith.addf %55, %58 : vector<32x16xf32>
    %60 = vector.extract_strided_slice %8 {offsets = [416, 0], sizes = [32, 8], strides = [1, 1]} : vector<512x8xbf16> to vector<32x8xbf16>
    %c104 = arith.constant 104 : index
    %c0_32 = arith.constant 0 : index
    %61 = vector.load %arg2[%c104, %c0_32] : memref<128x16xbf16, #tpu.memory_space<vmem>>, vector<8x16xbf16>
    %cst_33 = arith.constant dense<0.000000e+00> : vector<32x16xf32>
    %62 = tpu.matmul %60, %61, %cst_33 {dimension_numbers = #tpu.dot_dimension_numbers<[1], [0], [0], [1], [0, 0, 1, 1], [], []>} : vector<32x8xbf16>, vector<8x16xbf16>, vector<32x16xf32> -> vector<32x16xf32>
    %63 = arith.addf %59, %62 : vector<32x16xf32>
    %64 = vector.extract_strided_slice %8 {offsets = [448, 0], sizes = [32, 8], strides = [1, 1]} : vector<512x8xbf16> to vector<32x8xbf16>
    %c112 = arith.constant 112 : index
    %c0_34 = arith.constant 0 : index
    %65 = vector.load %arg2[%c112, %c0_34] : memref<128x16xbf16, #tpu.memory_space<vmem>>, vector<8x16xbf16>
    %cst_35 = arith.constant dense<0.000000e+00> : vector<32x16xf32>
    %66 = tpu.matmul %64, %65, %cst_35 {dimension_numbers = #tpu.dot_dimension_numbers<[1], [0], [0], [1], [0, 0, 1, 1], [], []>} : vector<32x8xbf16>, vector<8x16xbf16>, vector<32x16xf32> -> vector<32x16xf32>
    %67 = arith.addf %63, %66 : vector<32x16xf32>
    %68 = vector.extract_strided_slice %8 {offsets = [480, 0], sizes = [32, 8], strides = [1, 1]} : vector<512x8xbf16> to vector<32x8xbf16>
    %c120 = arith.constant 120 : index
    %c0_36 = arith.constant 0 : index
    %69 = vector.load %arg2[%c120, %c0_36] : memref<128x16xbf16, #tpu.memory_space<vmem>>, vector<8x16xbf16>
    %cst_37 = arith.constant dense<0.000000e+00> : vector<32x16xf32>
    %70 = tpu.matmul %68, %69, %cst_37 {dimension_numbers = #tpu.dot_dimension_numbers<[1], [0], [0], [1], [0, 0, 1, 1], [], []>} : vector<32x8xbf16>, vector<8x16xbf16>, vector<32x16xf32> -> vector<32x16xf32>
    %71 = arith.addf %67, %70 : vector<32x16xf32>
    %c0_38 = arith.constant 0 : index
    %c0_39 = arith.constant 0 : index
    %72 = vector.load %arg4[%c0_38, %c0_39] : memref<1x16xf32, #tpu.memory_space<vmem>>, vector<1x16xf32>
    %73 = vector.broadcast %72 : vector<1x16xf32> to vector<32x16xf32>
    %74 = arith.addf %71, %73 : vector<32x16xf32>
    %cst_40 = arith.constant 0.000000e+00 : f32
    %75 = vector.broadcast %cst_40 : f32 to vector<32x16xf32>
    %76 = arith.cmpf oge, %74, %75 : vector<32x16xf32>
    %cst_41 = arith.constant 2.000000e-01 : f32
    %77 = vector.broadcast %cst_41 : f32 to vector<32x16xf32>
    %78 = arith.mulf %77, %74 : vector<32x16xf32>
    %79 = arith.select %76, %74, %78 : vector<32x16xi1>, vector<32x16xf32>
    %80 = arith.truncf %79 : vector<32x16xf32> to vector<32x16xbf16>
    %81 = vector.extract_strided_slice %80 {offsets = [0, 0], sizes = [2, 16], strides = [1, 1]} : vector<32x16xbf16> to vector<2x16xbf16>
    %c0_42 = arith.constant 0 : index
    %c0_43 = arith.constant 0 : index
    %82 = vector.load %arg3[%c0_42, %c0_43] : memref<256x32xbf16, #tpu.memory_space<vmem>>, vector<16x32xbf16>
    %cst_44 = arith.constant dense<0.000000e+00> : vector<2x32xf32>
    %83 = tpu.matmul %81, %82, %cst_44 {dimension_numbers = #tpu.dot_dimension_numbers<[1], [0], [0], [1], [0, 0, 1, 1], [], []>} : vector<2x16xbf16>, vector<16x32xbf16>, vector<2x32xf32> -> vector<2x32xf32>
    %84 = vector.extract_strided_slice %80 {offsets = [2, 0], sizes = [2, 16], strides = [1, 1]} : vector<32x16xbf16> to vector<2x16xbf16>
    %c16_45 = arith.constant 16 : index
    %c0_46 = arith.constant 0 : index
    %85 = vector.load %arg3[%c16_45, %c0_46] : memref<256x32xbf16, #tpu.memory_space<vmem>>, vector<16x32xbf16>
    %cst_47 = arith.constant dense<0.000000e+00> : vector<2x32xf32>
    %86 = tpu.matmul %84, %85, %cst_47 {dimension_numbers = #tpu.dot_dimension_numbers<[1], [0], [0], [1], [0, 0, 1, 1], [], []>} : vector<2x16xbf16>, vector<16x32xbf16>, vector<2x32xf32> -> vector<2x32xf32>
    %87 = arith.addf %83, %86 : vector<2x32xf32>
    %88 = vector.extract_strided_slice %80 {offsets = [4, 0], sizes = [2, 16], strides = [1, 1]} : vector<32x16xbf16> to vector<2x16xbf16>
    %c32_48 = arith.constant 32 : index
    %c0_49 = arith.constant 0 : index
    %89 = vector.load %arg3[%c32_48, %c0_49] : memref<256x32xbf16, #tpu.memory_space<vmem>>, vector<16x32xbf16>
    %cst_50 = arith.constant dense<0.000000e+00> : vector<2x32xf32>
    %90 = tpu.matmul %88, %89, %cst_50 {dimension_numbers = #tpu.dot_dimension_numbers<[1], [0], [0], [1], [0, 0, 1, 1], [], []>} : vector<2x16xbf16>, vector<16x32xbf16>, vector<2x32xf32> -> vector<2x32xf32>
    %91 = arith.addf %87, %90 : vector<2x32xf32>
    %92 = vector.extract_strided_slice %80 {offsets = [6, 0], sizes = [2, 16], strides = [1, 1]} : vector<32x16xbf16> to vector<2x16xbf16>
    %c48_51 = arith.constant 48 : index
    %c0_52 = arith.constant 0 : index
    %93 = vector.load %arg3[%c48_51, %c0_52] : memref<256x32xbf16, #tpu.memory_space<vmem>>, vector<16x32xbf16>
    %cst_53 = arith.constant dense<0.000000e+00> : vector<2x32xf32>
    %94 = tpu.matmul %92, %93, %cst_53 {dimension_numbers = #tpu.dot_dimension_numbers<[1], [0], [0], [1], [0, 0, 1, 1], [], []>} : vector<2x16xbf16>, vector<16x32xbf16>, vector<2x32xf32> -> vector<2x32xf32>
    %95 = arith.addf %91, %94 : vector<2x32xf32>
    %96 = vector.extract_strided_slice %80 {offsets = [8, 0], sizes = [2, 16], strides = [1, 1]} : vector<32x16xbf16> to vector<2x16xbf16>
    %c64_54 = arith.constant 64 : index
    %c0_55 = arith.constant 0 : index
    %97 = vector.load %arg3[%c64_54, %c0_55] : memref<256x32xbf16, #tpu.memory_space<vmem>>, vector<16x32xbf16>
    %cst_56 = arith.constant dense<0.000000e+00> : vector<2x32xf32>
    %98 = tpu.matmul %96, %97, %cst_56 {dimension_numbers = #tpu.dot_dimension_numbers<[1], [0], [0], [1], [0, 0, 1, 1], [], []>} : vector<2x16xbf16>, vector<16x32xbf16>, vector<2x32xf32> -> vector<2x32xf32>
    %99 = arith.addf %95, %98 : vector<2x32xf32>
    %100 = vector.extract_strided_slice %80 {offsets = [10, 0], sizes = [2, 16], strides = [1, 1]} : vector<32x16xbf16> to vector<2x16xbf16>
    %c80_57 = arith.constant 80 : index
    %c0_58 = arith.constant 0 : index
    %101 = vector.load %arg3[%c80_57, %c0_58] : memref<256x32xbf16, #tpu.memory_space<vmem>>, vector<16x32xbf16>
    %cst_59 = arith.constant dense<0.000000e+00> : vector<2x32xf32>
    %102 = tpu.matmul %100, %101, %cst_59 {dimension_numbers = #tpu.dot_dimension_numbers<[1], [0], [0], [1], [0, 0, 1, 1], [], []>} : vector<2x16xbf16>, vector<16x32xbf16>, vector<2x32xf32> -> vector<2x32xf32>
    %103 = arith.addf %99, %102 : vector<2x32xf32>
    %104 = vector.extract_strided_slice %80 {offsets = [12, 0], sizes = [2, 16], strides = [1, 1]} : vector<32x16xbf16> to vector<2x16xbf16>
    %c96_60 = arith.constant 96 : index
    %c0_61 = arith.constant 0 : index
    %105 = vector.load %arg3[%c96_60, %c0_61] : memref<256x32xbf16, #tpu.memory_space<vmem>>, vector<16x32xbf16>
    %cst_62 = arith.constant dense<0.000000e+00> : vector<2x32xf32>
    %106 = tpu.matmul %104, %105, %cst_62 {dimension_numbers = #tpu.dot_dimension_numbers<[1], [0], [0], [1], [0, 0, 1, 1], [], []>} : vector<2x16xbf16>, vector<16x32xbf16>, vector<2x32xf32> -> vector<2x32xf32>
    %107 = arith.addf %103, %106 : vector<2x32xf32>
    %108 = vector.extract_strided_slice %80 {offsets = [14, 0], sizes = [2, 16], strides = [1, 1]} : vector<32x16xbf16> to vector<2x16xbf16>
    %c112_63 = arith.constant 112 : index
    %c0_64 = arith.constant 0 : index
    %109 = vector.load %arg3[%c112_63, %c0_64] : memref<256x32xbf16, #tpu.memory_space<vmem>>, vector<16x32xbf16>
    %cst_65 = arith.constant dense<0.000000e+00> : vector<2x32xf32>
    %110 = tpu.matmul %108, %109, %cst_65 {dimension_numbers = #tpu.dot_dimension_numbers<[1], [0], [0], [1], [0, 0, 1, 1], [], []>} : vector<2x16xbf16>, vector<16x32xbf16>, vector<2x32xf32> -> vector<2x32xf32>
    %111 = arith.addf %107, %110 : vector<2x32xf32>
    %112 = vector.extract_strided_slice %80 {offsets = [16, 0], sizes = [2, 16], strides = [1, 1]} : vector<32x16xbf16> to vector<2x16xbf16>
    %c128 = arith.constant 128 : index
    %c0_66 = arith.constant 0 : index
    %113 = vector.load %arg3[%c128, %c0_66] : memref<256x32xbf16, #tpu.memory_space<vmem>>, vector<16x32xbf16>
    %cst_67 = arith.constant dense<0.000000e+00> : vector<2x32xf32>
    %114 = tpu.matmul %112, %113, %cst_67 {dimension_numbers = #tpu.dot_dimension_numbers<[1], [0], [0], [1], [0, 0, 1, 1], [], []>} : vector<2x16xbf16>, vector<16x32xbf16>, vector<2x32xf32> -> vector<2x32xf32>
    %115 = arith.addf %111, %114 : vector<2x32xf32>
    %116 = vector.extract_strided_slice %80 {offsets = [18, 0], sizes = [2, 16], strides = [1, 1]} : vector<32x16xbf16> to vector<2x16xbf16>
    %c144 = arith.constant 144 : index
    %c0_68 = arith.constant 0 : index
    %117 = vector.load %arg3[%c144, %c0_68] : memref<256x32xbf16, #tpu.memory_space<vmem>>, vector<16x32xbf16>
    %cst_69 = arith.constant dense<0.000000e+00> : vector<2x32xf32>
    %118 = tpu.matmul %116, %117, %cst_69 {dimension_numbers = #tpu.dot_dimension_numbers<[1], [0], [0], [1], [0, 0, 1, 1], [], []>} : vector<2x16xbf16>, vector<16x32xbf16>, vector<2x32xf32> -> vector<2x32xf32>
    %119 = arith.addf %115, %118 : vector<2x32xf32>
    %120 = vector.extract_strided_slice %80 {offsets = [20, 0], sizes = [2, 16], strides = [1, 1]} : vector<32x16xbf16> to vector<2x16xbf16>
    %c160 = arith.constant 160 : index
    %c0_70 = arith.constant 0 : index
    %121 = vector.load %arg3[%c160, %c0_70] : memref<256x32xbf16, #tpu.memory_space<vmem>>, vector<16x32xbf16>
    %cst_71 = arith.constant dense<0.000000e+00> : vector<2x32xf32>
    %122 = tpu.matmul %120, %121, %cst_71 {dimension_numbers = #tpu.dot_dimension_numbers<[1], [0], [0], [1], [0, 0, 1, 1], [], []>} : vector<2x16xbf16>, vector<16x32xbf16>, vector<2x32xf32> -> vector<2x32xf32>
    %123 = arith.addf %119, %122 : vector<2x32xf32>
    %124 = vector.extract_strided_slice %80 {offsets = [22, 0], sizes = [2, 16], strides = [1, 1]} : vector<32x16xbf16> to vector<2x16xbf16>
    %c176 = arith.constant 176 : index
    %c0_72 = arith.constant 0 : index
    %125 = vector.load %arg3[%c176, %c0_72] : memref<256x32xbf16, #tpu.memory_space<vmem>>, vector<16x32xbf16>
    %cst_73 = arith.constant dense<0.000000e+00> : vector<2x32xf32>
    %126 = tpu.matmul %124, %125, %cst_73 {dimension_numbers = #tpu.dot_dimension_numbers<[1], [0], [0], [1], [0, 0, 1, 1], [], []>} : vector<2x16xbf16>, vector<16x32xbf16>, vector<2x32xf32> -> vector<2x32xf32>
    %127 = arith.addf %123, %126 : vector<2x32xf32>
    %128 = vector.extract_strided_slice %80 {offsets = [24, 0], sizes = [2, 16], strides = [1, 1]} : vector<32x16xbf16> to vector<2x16xbf16>
    %c192 = arith.constant 192 : index
    %c0_74 = arith.constant 0 : index
    %129 = vector.load %arg3[%c192, %c0_74] : memref<256x32xbf16, #tpu.memory_space<vmem>>, vector<16x32xbf16>
    %cst_75 = arith.constant dense<0.000000e+00> : vector<2x32xf32>
    %130 = tpu.matmul %128, %129, %cst_75 {dimension_numbers = #tpu.dot_dimension_numbers<[1], [0], [0], [1], [0, 0, 1, 1], [], []>} : vector<2x16xbf16>, vector<16x32xbf16>, vector<2x32xf32> -> vector<2x32xf32>
    %131 = arith.addf %127, %130 : vector<2x32xf32>
    %132 = vector.extract_strided_slice %80 {offsets = [26, 0], sizes = [2, 16], strides = [1, 1]} : vector<32x16xbf16> to vector<2x16xbf16>
    %c208 = arith.constant 208 : index
    %c0_76 = arith.constant 0 : index
    %133 = vector.load %arg3[%c208, %c0_76] : memref<256x32xbf16, #tpu.memory_space<vmem>>, vector<16x32xbf16>
    %cst_77 = arith.constant dense<0.000000e+00> : vector<2x32xf32>
    %134 = tpu.matmul %132, %133, %cst_77 {dimension_numbers = #tpu.dot_dimension_numbers<[1], [0], [0], [1], [0, 0, 1, 1], [], []>} : vector<2x16xbf16>, vector<16x32xbf16>, vector<2x32xf32> -> vector<2x32xf32>
    %135 = arith.addf %131, %134 : vector<2x32xf32>
    %136 = vector.extract_strided_slice %80 {offsets = [28, 0], sizes = [2, 16], strides = [1, 1]} : vector<32x16xbf16> to vector<2x16xbf16>
    %c224 = arith.constant 224 : index
    %c0_78 = arith.constant 0 : index
    %137 = vector.load %arg3[%c224, %c0_78] : memref<256x32xbf16, #tpu.memory_space<vmem>>, vector<16x32xbf16>
    %cst_79 = arith.constant dense<0.000000e+00> : vector<2x32xf32>
    %138 = tpu.matmul %136, %137, %cst_79 {dimension_numbers = #tpu.dot_dimension_numbers<[1], [0], [0], [1], [0, 0, 1, 1], [], []>} : vector<2x16xbf16>, vector<16x32xbf16>, vector<2x32xf32> -> vector<2x32xf32>
    %139 = arith.addf %135, %138 : vector<2x32xf32>
    %140 = vector.extract_strided_slice %80 {offsets = [30, 0], sizes = [2, 16], strides = [1, 1]} : vector<32x16xbf16> to vector<2x16xbf16>
    %c240 = arith.constant 240 : index
    %c0_80 = arith.constant 0 : index
    %141 = vector.load %arg3[%c240, %c0_80] : memref<256x32xbf16, #tpu.memory_space<vmem>>, vector<16x32xbf16>
    %cst_81 = arith.constant dense<0.000000e+00> : vector<2x32xf32>
    %142 = tpu.matmul %140, %141, %cst_81 {dimension_numbers = #tpu.dot_dimension_numbers<[1], [0], [0], [1], [0, 0, 1, 1], [], []>} : vector<2x16xbf16>, vector<16x32xbf16>, vector<2x32xf32> -> vector<2x32xf32>
    %143 = arith.addf %139, %142 : vector<2x32xf32>
    %c0_82 = arith.constant 0 : index
    %c0_83 = arith.constant 0 : index
    %144 = vector.load %arg5[%c0_82, %c0_83] : memref<2x32xf32, #tpu.memory_space<vmem>>, vector<2x32xf32>
    tpu.vector_store %arg5[%c0_82, %c0_83], %143 {strides = array<i32>} : memref<2x32xf32, #tpu.memory_space<vmem>>, vector<2x32xf32>,
    return
  }
}

</mosaic_0001>

<bundles_post_ra>
// kernel: forward.1
= control target key start
LH: loop header
LB: loop body
LE: loop exit
PB: predicated region body
PF: predicated region fallthrough
CT: control target
= control target key end

     0   :  { %s2860_s0 = inlined_call_operand.vmem [shape: bf16[512,64], index: 0, kind: input, shape index: {}]   ;;  %s2861_s1 = inlined_call_operand.vmem [shape: bf16[64,8], index: 1, kind: input, shape index: {}]   ;;  %s2862_s2 = inlined_call_operand.vmem [shape: bf16[128,16], index: 2, kind: input, shape index: {}]   ;;  %s2863_s3 = inlined_call_operand.vmem [shape: bf16[256,32], index: 3, kind: input, shape index: {}]   ;;  %s2864_s4 = inlined_call_operand.vmem [shape: f32[1,16], index: 4, kind: input, shape index: {}]   ;;  %s2865_s5 = inlined_call_operand.hbm [shape: f32[2,32], index: 5, kind: output, shape index: {}]  }
   0x1   :  { %v2270_v0 = vld [vmem:[%s2861_s1 + $0x18] sm:$0xff]  ;;  %v2269_v1 = vld [vmem:[%s2861_s1 + $0x10] sm:$0xff] }
   0x2   :  { %379 = vmatpush.bf16.msra.mxu0 %v2270_v0  ;;  %2288 = vmatpush.bf16.msra.mxu2 %v2270_v0 }
   0x3   :  { %10 = vsyncpa [#allocation3], 0  ;;  %2287 = vmatpush.bf16.msra.mxu1 %v2270_v0  ;;  %2289 = vmatpush.bf16.msra.mxu3 %v2270_v0  ;;  %v2268_v2 = vld [vmem:[%s2861_s1 + $0x8] sm:$0xff]  ;;  %v2267_v3 = vld [vmem:[%s2861_s1] sm:$0xff]  ;;  %vm278_vm0 = vcmask 523264   ;;  %vm819_vm1 = vcmask 1043456  }
   0x4   :  { %v2235_v4 = vld [vmem:[%s2860_s0] sm:$0xff]  ;;  %v2236_v5 = vld [vmem:[%s2860_s0 + $0x8] sm:$0xff]  ;;  %v2237_v6 = vld [vmem:[%s2860_s0 + $0x10] sm:$0xff]  ;;  %vm812_vm4 = vcmask 64512   ;;  %s1938_s24 = sshll.u32 %s2865_s5, 4  ;;  %s1939_s24 = int_to_ptr.hbm [resolvable:$true] %s1938_s24 }
   0x5   :  { %v2259_v7 = vld [vmem:[%s2860_s0 + $0xc0] sm:$0xff]  ;;  %v2238_v8 = vld [vmem:[%s2860_s0 + $0x18] sm:$0xff]  ;;  %v2260_v9 = vld [vmem:[%s2860_s0 + $0xc8] sm:$0xff] }
   0x6   :  { %380 = vmatpush.bf16.msra.mxu0 %v2269_v1  ;;  %2291 = vmatpush.bf16.msra.mxu2 %v2269_v1  ;;  %v2239_v10 = vld [vmem:[%s2860_s0 + $0x20] sm:$0xff]  ;;  %v2261_v12 = vld [vmem:[%s2860_s0 + $0xd0] sm:$0xff]  ;;  %v2240_v13 = vld [vmem:[%s2860_s0 + $0x28] sm:$0xff] }
   0x7   :  { %2290 = vmatpush.bf16.msra.mxu1 %v2269_v1  ;;  %2292 = vmatpush.bf16.msra.mxu3 %v2269_v1  ;;  %v2255_v11 = vld [vmem:[%s2860_s0 + $0xa0] sm:$0xff]  ;;  %v2241_v14 = vld [vmem:[%s2860_s0 + $0x30] sm:$0xff]  ;;  %v2256_v15 = vld [vmem:[%s2860_s0 + $0xa8] sm:$0xff] }
   0x8   :  { %v2262_v16 = vld [vmem:[%s2860_s0 + $0xd8] sm:$0xff]  ;;  %v800_v17 = vld [vmem:[%s2862_s2] sm:$0xf]  ;;  %v2257_v20 = vld [vmem:[%s2860_s0 + $0xb0] sm:$0xff] }
   0x9   :  { %v859_v18 = vsel %vm819_vm1, %v800_v17, 0  ;;  %v2242_v19 = vld [vmem:[%s2860_s0 + $0x38] sm:$0xff]  ;;  %v2263_v21 = vld [vmem:[%s2860_s0 + $0xe0] sm:$0xff]  ;;  %v2264_v25 = vld [vmem:[%s2860_s0 + $0xe8] sm:$0xff] }
   0xa   :  { %381 = vmatpush.bf16.msra.mxu0 %v2268_v2  ;;  %2294 = vmatpush.bf16.msra.mxu2 %v2268_v2  ;;  %v2243_v22 = vld [vmem:[%s2860_s0 + $0x40] sm:$0xff]  ;;  %v2258_v24 = vld [vmem:[%s2860_s0 + $0xb8] sm:$0xff]  ;;  %v2244_v37 = vld [vmem:[%s2860_s0 + $0x48] sm:$0xff] }
   0xb   :  { %2293 = vmatpush.bf16.msra.mxu1 %v2268_v2  ;;  %2295 = vmatpush.bf16.msra.mxu3 %v2268_v2  ;;  %v801_v33 = vld [vmem:[%s2862_s2 + $0x4] sm:$0xf]  ;;  %v2265_v40 = vld [vmem:[%s2860_s0 + $0xf0] sm:$0xff]  ;;  %v2266_v53 = vld [vmem:[%s2860_s0 + $0xf8] sm:$0xff] }
   0xc   :  { %v821_v36 = vsel %vm819_vm1, %v801_v33, 0  ;;  %v2245_v50 = vld [vmem:[%s2860_s0 + $0x50] sm:$0xff]  ;;  %v880_v61 = vld [vmem:[%s2862_s2 + $0x8] sm:$0xf]  ;;  %v2246_v1 = vld [vmem:[%s2860_s0 + $0x58] sm:$0xff] }
   0xd   :  { %v898_v0 = vsel %vm819_vm1, %v880_v61, 0 }
   0xe   :  { %382 = vmatpush.bf16.msra.mxu0 %v2267_v3  ;;  %2297 = vmatpush.bf16.msra.mxu2 %v2267_v3 }
   0xf   :  { %2296 = vmatpush.bf16.msra.mxu1 %v2267_v3  ;;  %2298 = vmatpush.bf16.msra.mxu3 %v2267_v3 }
  0x11   :  { %2091 = vmatmul.msk.bf16.vlgmr.msra.gmra.mxu0 %vm278_vm0, %v2235_v4  ;;  %2115 = vmatmul.msk.bf16.vlgmr.msra.gmra.mxu2 %vm278_vm0, %v2259_v7 }
  0x12   :  { %2111 = vmatmul.msk.bf16.vlgmr.msra.gmra.mxu1 %vm278_vm0, %v2255_v11  ;;  %868 = vmatpush.bf16.msrb.mxu2 %v859_v18 }
  0x13   :  { %2119 = vmatmul.msk.bf16.vlgmr.msra.gmra.mxu3 %vm278_vm0, %v2263_v21  ;;  %830 = vmatpush.bf16.msrb.mxu1 %v821_v36 }
  0x14   :  { %907 = vmatpush.bf16.msrb.mxu3 %v898_v0 }
  0x21   :  { %2092 = vmatmul.msk.bf16.gmra.mxu0 %vm278_vm0, %v2236_v5  ;;  %2116 = vmatmul.msk.bf16.gmra.mxu2 %vm278_vm0, %v2260_v9 }
  0x22   :  { %2112 = vmatmul.msk.bf16.gmra.mxu1 %vm278_vm0, %v2256_v15 }
  0x23   :  { %2120 = vmatmul.msk.bf16.gmra.mxu3 %vm278_vm0, %v2264_v25 }
  0x31   :  { %2093 = vmatmul.msk.bf16.gmra.mxu0 %vm278_vm0, %v2237_v6  ;;  %2117 = vmatmul.msk.bf16.gmra.mxu2 %vm278_vm0, %v2261_v12 }
  0x32   :  { %2113 = vmatmul.msk.bf16.gmra.mxu1 %vm278_vm0, %v2257_v20 }
  0x33   :  { %2121 = vmatmul.msk.bf16.gmra.mxu3 %vm278_vm0, %v2265_v40 }
  0x41   :  { %2094 = vmatmul.msk.bf16.gmra.mxu0 %vm278_vm0, %v2238_v8  ;;  %2118 = vmatmul.msk.bf16.gmra.mxu2 %vm278_vm0, %v2262_v16 }
  0x42   :  { %2114 = vmatmul.msk.bf16.gmra.mxu1 %vm278_vm0, %v2258_v24 }
  0x43   :  { %2122 = vmatmul.msk.bf16.gmra.mxu3 %vm278_vm0, %v2266_v53 }
  0x51   :  { %2095 = vmatmul.msk.bf16.gmra.mxu0 %vm278_vm0, %v2239_v10 }
  0x61   :  { %2096 = vmatmul.msk.bf16.gmra.mxu0 %vm278_vm0, %v2240_v13 }
  0x71   :  { %2097 = vmatmul.msk.bf16.gmra.mxu0 %vm278_vm0, %v2241_v14 }
  0x81   :  { %2098 = vmatmul.msk.bf16.gmra.mxu0 %vm278_vm0, %v2242_v19  ;;  %v2247_v19 = vld [vmem:[%s2860_s0 + $0x60] sm:$0xff] }
  0x8e   :  { %v384_v23 = vpop.f32.mrf.mxu0 }
  0x8f   :  { %v608_v26 = vmul.f32 0.2, %v384_v23  ;;  %vm544_vm2 = vcmp.ge.f32.partialorder %v384_v23, 0.0 }
  0x91   :  { %2099 = vmatmul.msk.bf16.gmra.mxu0 %vm278_vm0, %v2243_v22  ;;  %v672_v27 = vsel %vm544_vm2, %v384_v23, %v608_v26 }
  0x92   :  { %v736_v30 = vpack.c.bf16 %v672_v27, %v672_v27 }
  0x94   :  { %v846_v34 = vunpack.c.l.b16 %v736_v30  ;;  %v504_v5 = vpop.f32.mrf.mxu2 }
  0x95   :  { %v656_v6 = vmul.f32 0.2, %v504_v5  ;;  %vm592_vm10 = vcmp.ge.f32.partialorder %v504_v5, 0.0 }
  0x96   :  { %v386_v28 = vpop.f32.mrf.mxu0 }
  0x97   :  { %vm545_vm3 = vcmp.ge.f32.partialorder %v386_v28, 0.0  ;;  %v609_v29 = vmul.f32 0.2, %v386_v28  ;;  %v720_v11 = vsel %vm592_vm10, %v504_v5, %v656_v6 }
  0x98   :  { %v784_v14 = vpack.c.bf16 %v720_v11, %v720_v11 }
  0x99   :  { %v673_v31 = vsel %vm545_vm3, %v386_v28, %v609_v29 }
  0x9a   :  { %v737_v32 = vpack.c.bf16 %v673_v31, %v673_v31  ;;  %v2484_v23 = vunpack.c.l.b16 %v784_v14 }
  0x9c   :  { %v847_v35 = vunpack.c.l.b16 %v737_v32  ;;  %v506_v15 = vpop.f32.mrf.mxu2 }
  0x9d   :  { %vm593_vm12 = vcmp.ge.f32.partialorder %v506_v15, 0.0  ;;  %v657_v18 = vmul.f32 0.2, %v506_v15 }
  0x9e   :  { %v389_v38 = vpop.f32.mrf.mxu0  ;;  %v850_v39 = vpack.c.b16 %v847_v35, %v846_v34  ;;  %v923_v34 = vld [vmem:[%s2862_s2 + $0xc] sm:$0xf] }
  0x9f   :  { %v610_v41 = vmul.f32 0.2, %v389_v38  ;;  %vm546_vm5 = vcmp.ge.f32.partialorder %v389_v38, 0.0  ;;  %v721_v22 = vsel %vm593_vm12, %v506_v15, %v657_v18  ;;  %v2251_v18 = vld [vmem:[%s2860_s0 + $0x80] sm:$0xff] }
  0xa0   :  { %2125 = vmatmul.msk.bf16.vlgmr.msrb.gmra.mxu2 %vm812_vm4, %v850_v39  ;;  %v785_v24 = vpack.c.bf16 %v721_v22, %v721_v22 }
  0xa1   :  { %2100 = vmatmul.msk.bf16.gmra.mxu0 %vm278_vm0, %v2244_v37  ;;  %v674_v42 = vsel %vm546_vm5, %v389_v38, %v610_v41  ;;  %v941_v37 = vsel %vm819_vm1, %v923_v34, 0  ;;  %v2248_v38 = vld [vmem:[%s2860_s0 + $0x68] sm:$0xff] }
  0xa2   :  { %v738_v45 = vpack.c.bf16 %v674_v42, %v674_v42  ;;  %v2488_v26 = vunpack.c.l.b16 %v785_v24  ;;  %950 = vmatpush.bf16.msra.mxu1 %v941_v37  ;;  %v2534_v24 = vpop.f32.mrf.mxu3 }
  0xa4   :  { %v848_v48 = vunpack.c.l.b16 %v738_v45  ;;  %v1319_v27 = vpack.c.b16 %v2488_v26, %v2484_v23 }
  0xa6   :  { %v391_v43 = vpop.f32.mrf.mxu0 }
  0xa7   :  { %vm547_vm6 = vcmp.ge.f32.partialorder %v391_v43, 0.0  ;;  %v611_v44 = vmul.f32 0.2, %v391_v43 }
  0xa9   :  { %v675_v46 = vsel %vm547_vm6, %v391_v43, %v611_v44 }
  0xaa   :  { %v739_v47 = vpack.c.bf16 %v675_v46, %v675_v46 }
  0xac   :  { %v849_v49 = vunpack.c.l.b16 %v739_v47 }
  0xae   :  { %v394_v51 = vpop.f32.mrf.mxu0  ;;  %v851_v52 = vpack.c.b16 %v849_v49, %v848_v48 }
  0xaf   :  { %v612_v54 = vmul.f32 0.2, %v394_v51  ;;  %vm548_vm7 = vcmp.ge.f32.partialorder %v394_v51, 0.0 }
  0xb0   :  { %2126 = vmatmul.msk.bf16.gmra.mxu2 %vm812_vm4, %v851_v52 }
  0xb1   :  { %2101 = vmatmul.msk.bf16.gmra.mxu0 %vm278_vm0, %v2245_v50  ;;  %v676_v55 = vsel %vm548_vm7, %v394_v51, %v612_v54  ;;  %v2249_v50 = vld [vmem:[%s2860_s0 + $0x70] sm:$0xff]  ;;  %v2504_v51 = vpop.f32.mrf.mxu1 }
  0xb2   :  { %v740_v58 = vpack.c.bf16 %v676_v55, %v676_v55 }
  0xb4   :  { %v806_v62 = vunpack.c.l.b16 %v740_v58 }
  0xb6   :  { %v396_v56 = vpop.f32.mrf.mxu0 }
  0xb7   :  { %vm549_vm8 = vcmp.ge.f32.partialorder %v396_v56, 0.0  ;;  %v613_v57 = vmul.f32 0.2, %v396_v56 }
  0xb9   :  { %v677_v59 = vsel %vm549_vm8, %v396_v56, %v613_v57  ;;  %v2508_v58 = vpop.f32.mrf.mxu1 }
  0xba   :  { %v741_v60 = vpack.c.bf16 %v677_v59, %v677_v59 }
  0xbc   :  { %v807_v63 = vunpack.c.l.b16 %v741_v60 }
  0xbe   :  { %v399_v2 = vpop.f32.mrf.mxu0  ;;  %v810_v3 = vpack.c.b16 %v807_v63, %v806_v62  ;;  %v966_v62 = vld [vmem:[%s2862_s2 + $0x10] sm:$0xf] }
  0xbf   :  { %v614_v4 = vmul.f32 0.2, %v399_v2  ;;  %vm550_vm9 = vcmp.ge.f32.partialorder %v399_v2, 0.0 }
  0xc0   :  { %2123 = vmatmul.msk.bf16.vlgmr.msrb.gmra.mxu1 %vm812_vm4, %v810_v3  ;;  %v2250_v3 = vld [vmem:[%s2860_s0 + $0x78] sm:$0xff] }
  0xc1   :  { %2102 = vmatmul.msk.bf16.gmra.mxu0 %vm278_vm0, %v2246_v1  ;;  %v678_v7 = vsel %vm550_vm9, %v399_v2, %v614_v4  ;;  %v984_v1 = vsel %vm819_vm1, %v966_v62, 0  ;;  %v2514_v2 = vpop.f32.mrf.mxu2 }
  0xc2   :  { %v742_v10 = vpack.c.bf16 %v678_v7, %v678_v7  ;;  %993 = vmatpush.bf16.msra.mxu2 %v984_v1  ;;  %v2521_v7 = vpop.f32.mrf.mxu1 }
  0xc4   :  { %v808_v16 = vunpack.c.l.b16 %v742_v10 }
  0xc6   :  { %v401_v8 = vpop.f32.mrf.mxu0 }
  0xc7   :  { %vm551_vm11 = vcmp.ge.f32.partialorder %v401_v8, 0.0  ;;  %v615_v9 = vmul.f32 0.2, %v401_v8 }
  0xc9   :  { %v679_v12 = vsel %vm551_vm11, %v401_v8, %v615_v9  ;;  %v2523_v10 = vpop.f32.mrf.mxu2 }
  0xca   :  { %v743_v13 = vpack.c.bf16 %v679_v12, %v679_v12  ;;  %v2525_v15 = vpop.f32.mrf.mxu1 }
  0xcc   :  { %v809_v17 = vunpack.c.l.b16 %v743_v13 }
  0xce   :  { %v404_v20 = vpop.f32.mrf.mxu0  ;;  %v811_v21 = vpack.c.b16 %v809_v17, %v808_v16 }
  0xcf   :  { %v616_v25 = vmul.f32 0.2, %v404_v20  ;;  %vm552_vm13 = vcmp.ge.f32.partialorder %v404_v20, 0.0 }
  0xd0   :  { %2124 = vmatmul.msk.bf16.gmra.mxu1 %vm812_vm4, %v811_v21 }
  0xd1   :  { %2103 = vmatmul.msk.bf16.gmra.mxu0 %vm278_vm0, %v2247_v19  ;;  %v680_v28 = vsel %vm552_vm13, %v404_v20, %v616_v25  ;;  %v2531_v21 = vpop.f32.mrf.mxu2 }
  0xd2   :  { %v744_v31 = vpack.c.bf16 %v680_v28, %v680_v28  ;;  %v2536_v28 = vpop.f32.mrf.mxu1 }
  0xd4   :  { %v885_v35 = vunpack.c.l.b16 %v744_v31 }
  0xd6   :  { %v406_v29 = vpop.f32.mrf.mxu0 }
  0xd7   :  { %vm553_vm14 = vcmp.ge.f32.partialorder %v406_v29, 0.0  ;;  %v617_v30 = vmul.f32 0.2, %v406_v29 }
  0xd9   :  { %v681_v32 = vsel %vm553_vm14, %v406_v29, %v617_v30  ;;  %v2538_v34 = vpop.f32.mrf.mxu2 }
  0xda   :  { %v745_v33 = vpack.c.bf16 %v681_v32, %v681_v32 }
  0xdc   :  { %v886_v36 = vunpack.c.l.b16 %v745_v33 }
  0xde   :  { %v409_v39 = vpop.f32.mrf.mxu0  ;;  %v889_v40 = vpack.c.b16 %v886_v36, %v885_v35  ;;  %v1009_v35 = vld [vmem:[%s2862_s2 + $0x14] sm:$0xf] }
  0xdf   :  { %v618_v41 = vmul.f32 0.2, %v409_v39  ;;  %vm554_vm15 = vcmp.ge.f32.partialorder %v409_v39, 0.0 }
  0xe0   :  { %2127 = vmatmul.msk.bf16.vlgmr.msrb.gmra.mxu3 %vm812_vm4, %v889_v40  ;;  %v2547_v40 = vpop.f32.mrf.mxu3 }
  0xe1   :  { %2104 = vmatmul.msk.bf16.gmra.mxu0 %vm278_vm0, %v2248_v38  ;;  %v682_v42 = vsel %vm554_vm15, %v409_v39, %v618_v41  ;;  %v1027_v38 = vsel %vm819_vm1, %v1009_v35, 0  ;;  %v2252_v39 = vld [vmem:[%s2860_s0 + $0x88] sm:$0xff] }
  0xe2   :  { %v746_v45 = vpack.c.bf16 %v682_v42, %v682_v42  ;;  %1036 = vmatpush.bf16.msra.mxu3 %v1027_v38 }
  0xe4   :  { %v887_v48 = vunpack.c.l.b16 %v746_v45  ;;  %v2553_v45 = vpop.f32.mrf.mxu2 }
  0xe6   :  { %v411_v43 = vpop.f32.mrf.mxu0 }
  0xe7   :  { %vm555_vm2 = vcmp.ge.f32.partialorder %v411_v43, 0.0  ;;  %v619_v44 = vmul.f32 0.2, %v411_v43 }
  0xe9   :  { %v683_v46 = vsel %vm555_vm2, %v411_v43, %v619_v44  ;;  %v2549_v43 = vpop.f32.mrf.mxu1 }
  0xea   :  { %v747_v47 = vpack.c.bf16 %v683_v46, %v683_v46 }
  0xec   :  { %v888_v49 = vunpack.c.l.b16 %v747_v47 }
  0xee   :  { %v414_v52 = vpop.f32.mrf.mxu0  ;;  %v890_v53 = vpack.c.b16 %v888_v49, %v887_v48  ;;  %v2555_v49 = vpop.f32.mrf.mxu3 }
  0xef   :  { %v620_v54 = vmul.f32 0.2, %v414_v52  ;;  %vm556_vm3 = vcmp.ge.f32.partialorder %v414_v52, 0.0 }
  0xf0   :  { %2128 = vmatmul.msk.bf16.gmra.mxu3 %vm812_vm4, %v890_v53 }
  0xf1   :  { %2105 = vmatmul.msk.bf16.gmra.mxu0 %vm278_vm0, %v2249_v50  ;;  %v684_v55 = vsel %vm556_vm3, %v414_v52, %v620_v54  ;;  %v2557_v53 = vpop.f32.mrf.mxu1 }
  0xf2   :  { %v748_v59 = vpack.c.bf16 %v684_v55, %v684_v55 }
  0xf4   :  { %v928_v63 = vunpack.c.l.b16 %v748_v59 }
  0xf6   :  { %v416_v56 = vpop.f32.mrf.mxu0 }
  0xf7   :  { %vm557_vm5 = vcmp.ge.f32.partialorder %v416_v56, 0.0  ;;  %v621_v57 = vmul.f32 0.2, %v416_v56 }
  0xf9   :  { %v685_v60 = vsel %vm557_vm5, %v416_v56, %v621_v57  ;;  %v2253_v57 = vld [vmem:[%s2860_s0 + $0x90] sm:$0xff] }
  0xfa   :  { %v749_v61 = vpack.c.bf16 %v685_v60, %v685_v60 }
  0xfc   :  { %v929_v0 = vunpack.c.l.b16 %v749_v61  ;;  %v2562_v61 = vpop.f32.mrf.mxu2 }
  0xfe   :  { %v932_v4 = vpack.c.b16 %v929_v0, %v928_v63  ;;  %v419_v5 = vpop.f32.mrf.mxu0  ;;  %v2566_v63 = vpop.f32.mrf.mxu3 }
  0xff   :  { %v622_v6 = vmul.f32 0.2, %v419_v5  ;;  %vm558_vm6 = vcmp.ge.f32.partialorder %v419_v5, 0.0  ;;  %v2568_v0 = vpop.f32.mrf.mxu1 }
 0x100   :  { %2129 = vmatmul.msk.bf16.vlgmr.msra.gmra.mxu1 %vm812_vm4, %v932_v4 }
 0x101   :  { %2106 = vmatmul.msk.bf16.gmra.mxu0 %vm278_vm0, %v2250_v3  ;;  %v686_v8 = vsel %vm558_vm6, %v419_v5, %v622_v6 }
 0x102   :  { %v750_v12 = vpack.c.bf16 %v686_v8, %v686_v8 }
 0x104   :  { %v930_v16 = vunpack.c.l.b16 %v750_v12  ;;  %v1052_v12 = vld [vmem:[%s2862_s2 + $0x18] sm:$0xf] }
 0x106   :  { %v421_v9 = vpop.f32.mrf.mxu0 }
 0x107   :  { %vm559_vm7 = vcmp.ge.f32.partialorder %v421_v9, 0.0  ;;  %v623_v11 = vmul.f32 0.2, %v421_v9 }
 0x109   :  { %v687_v13 = vsel %vm559_vm7, %v421_v9, %v623_v11  ;;  %v2570_v11 = vpop.f32.mrf.mxu3 }
 0x10a   :  { %v751_v14 = vpack.c.bf16 %v687_v13, %v687_v13 }
 0x10c   :  { %v931_v17 = vunpack.c.l.b16 %v751_v14 }
 0x10e   :  { %v424_v19 = vpop.f32.mrf.mxu0  ;;  %v933_v20 = vpack.c.b16 %v931_v17, %v930_v16  ;;  %v1070_v16 = vsel %vm819_vm1, %v1052_v12, 0 }
 0x10f   :  { %v624_v22 = vmul.f32 0.2, %v424_v19  ;;  %vm560_vm8 = vcmp.ge.f32.partialorder %v424_v19, 0.0  ;;  %1079 = vmatpush.bf16.msrb.mxu1 %v1070_v16 }
 0x110   :  { %2130 = vmatmul.msk.bf16.gmra.mxu1 %vm812_vm4, %v933_v20 }
 0x111   :  { %2107 = vmatmul.msk.bf16.gmra.mxu0 %vm278_vm0, %v2251_v18  ;;  %v688_v25 = vsel %vm560_vm8, %v424_v19, %v624_v22  ;;  %v2254_v18 = vld [vmem:[%s2860_s0 + $0x98] sm:$0xff] }
 0x112   :  { %v752_v31 = vpack.c.bf16 %v688_v25, %v688_v25 }
 0x114   :  { %v971_v36 = vunpack.c.l.b16 %v752_v31 }
 0x116   :  { %v426_v29 = vpop.f32.mrf.mxu0 }
 0x117   :  { %vm561_vm9 = vcmp.ge.f32.partialorder %v426_v29, 0.0  ;;  %v625_v30 = vmul.f32 0.2, %v426_v29 }
 0x119   :  { %v689_v32 = vsel %vm561_vm9, %v426_v29, %v625_v30 }
 0x11a   :  { %v753_v33 = vpack.c.bf16 %v689_v32, %v689_v32  ;;  %v2585_v32 = vpop.f32.mrf.mxu3 }
 0x11b   :  { %v669_v23 = vmul.f32 0.2, %v2585_v32 }
 0x11c   :  { %v972_v37 = vunpack.c.l.b16 %v753_v33 }
 0x11e   :  { %v975_v41 = vpack.c.b16 %v972_v37, %v971_v36  ;;  %v429_v42 = vpop.f32.mrf.mxu0 }
 0x11f   :  { %v626_v44 = vmul.f32 0.2, %v429_v42  ;;  %vm562_vm10 = vcmp.ge.f32.partialorder %v429_v42, 0.0 }
 0x120   :  { %2131 = vmatmul.msk.bf16.vlgmr.msra.gmra.mxu2 %vm812_vm4, %v975_v41 }
 0x121   :  { %2108 = vmatmul.msk.bf16.gmra.mxu0 %vm278_vm0, %v2252_v39  ;;  %v690_v46 = vsel %vm562_vm10, %v429_v42, %v626_v44  ;;  %vm584_vm10 = vcmp.ge.f32.partialorder %v2504_v51, 0.0 }
 0x122   :  { %v754_v50 = vpack.c.bf16 %v690_v46, %v690_v46 }
 0x123   :  { %v870_v6 = vpop.f32.mrf.mxu2 }
 0x124   :  { %v973_v55 = vunpack.c.l.b16 %v754_v50  ;;  %v2587_v50 = vpop.f32.mrf.mxu3 }
 0x126   :  { %v431_v47 = vpop.f32.mrf.mxu0 }
 0x127   :  { %vm563_vm11 = vcmp.ge.f32.partialorder %v431_v47, 0.0  ;;  %v627_v48 = vmul.f32 0.2, %v431_v47 }
 0x129   :  { %v691_v52 = vsel %vm563_vm11, %v431_v47, %v627_v48  ;;  %vm585_vm11 = vcmp.ge.f32.partialorder %v2508_v58, 0.0 }
 0x12a   :  { %v755_v54 = vpack.c.bf16 %v691_v52, %v691_v52 }
 0x12b   :  { %v2581_v29 = vpop.f32.mrf.mxu2 }
 0x12c   :  { %v974_v56 = vunpack.c.l.b16 %v755_v54 }
 0x12e   :  { %v434_v59 = vpop.f32.mrf.mxu0  ;;  %v976_v60 = vpack.c.b16 %v974_v56, %v973_v55 }
 0x12f   :  { %v628_v62 = vmul.f32 0.2, %v434_v59  ;;  %vm564_vm12 = vcmp.ge.f32.partialorder %v434_v59, 0.0 }
 0x130   :  { %2132 = vmatmul.msk.bf16.gmra.mxu2 %vm812_vm4, %v976_v60  ;;  %v2590_v60 = vpop.f32.mrf.mxu3 }
 0x131   :  { %2109 = vmatmul.msk.bf16.gmra.mxu0 %vm278_vm0, %v2253_v57  ;;  %v692_v1 = vsel %vm564_vm12, %v434_v59, %v628_v62 }
 0x132   :  { %v756_v5 = vpack.c.bf16 %v692_v1, %v692_v1  ;;  %v1095_v1 = vld [vmem:[%s2862_s2 + $0x1c] sm:$0xf] }
 0x133   :  { %v875_v42 = vpop.f32.mrf.mxu2 }
 0x134   :  { %v1014_v13 = vunpack.c.l.b16 %v756_v5  ;;  %v1113_v5 = vsel %vm819_vm1, %v1095_v1, 0 }
 0x135   :  { %1122 = vmatpush.bf16.msrb.mxu2 %v1113_v5 }
 0x136   :  { %v436_v3 = vpop.f32.mrf.mxu0 }
 0x137   :  { %vm565_vm13 = vcmp.ge.f32.partialorder %v436_v3, 0.0  ;;  %v629_v4 = vmul.f32 0.2, %v436_v3 }
 0x139   :  { %v693_v8 = vsel %vm565_vm13, %v436_v3, %v629_v4 }
 0x13a   :  { %v757_v9 = vpack.c.bf16 %v693_v8, %v693_v8 }
 0x13c   :  { %v1015_v14 = vunpack.c.l.b16 %v757_v9 }
 0x13d   :  { %v832_v17 = vpop.f32.mrf.mxu1 }
 0x13e   :  { %v1018_v19 = vpack.c.b16 %v1015_v14, %v1014_v13  ;;  %v871_v20 = vadd.f32 %v870_v6, %v832_v17  ;;  %v439_v22 = vpop.f32.mrf.mxu0 }
 0x13f   :  { %v630_v25 = vmul.f32 0.2, %v439_v22  ;;  %vm566_vm14 = vcmp.ge.f32.partialorder %v439_v22, 0.0 }
 0x140   :  { %2133 = vmatmul.msk.bf16.vlgmr.msra.gmra.mxu3 %vm812_vm4, %v1018_v19 }
 0x141   :  { %2110 = vmatmul.msk.bf16.gmra.mxu0 %vm278_vm0, %v2254_v18  ;;  %v694_v30 = vsel %vm566_vm14, %v439_v22, %v630_v25  ;;  %vm586_vm14 = vcmp.ge.f32.partialorder %v2521_v7, 0.0 }
 0x142   :  { %v758_v36 = vpack.c.bf16 %v694_v30, %v694_v30 }
 0x144   :  { %v1016_v39 = vunpack.c.l.b16 %v758_v36 }
 0x145   :  { %v2583_v31 = vpop.f32.mrf.mxu1 }
 0x146   :  { %v441_v33 = vpop.f32.mrf.mxu0 }
 0x147   :  { %vm567_vm15 = vcmp.ge.f32.partialorder %v441_v33, 0.0  ;;  %v631_v35 = vmul.f32 0.2, %v441_v33 }
 0x149   :  { %v695_v37 = vsel %vm567_vm15, %v441_v33, %v631_v35  ;;  %vm587_vm15 = vcmp.ge.f32.partialorder %v2525_v15, 0.0 }
 0x14a   :  { %v759_v38 = vpack.c.bf16 %v695_v37, %v695_v37 }
 0x14c   :  { %v1017_v41 = vunpack.c.l.b16 %v759_v38 }
 0x14d   :  { %v837_v44 = vpop.f32.mrf.mxu1 }
 0x14e   :  { %v876_v46 = vadd.f32 %v875_v42, %v837_v44  ;;  %v444_v47 = vpop.f32.mrf.mxu0  ;;  %v1019_v48 = vpack.c.b16 %v1017_v41, %v1016_v39 }
 0x14f   :  { %v632_v52 = vmul.f32 0.2, %v444_v47  ;;  %vm568_vm0 = vcmp.ge.f32.partialorder %v444_v47, 0.0 }
 0x150   :  { %2134 = vmatmul.msk.bf16.gmra.mxu3 %vm812_vm4, %v1019_v48 }
 0x151   :  { %v696_v54 = vsel %vm568_vm0, %v444_v47, %v632_v52  ;;  %vm594_vm0 = vcmp.ge.f32.partialorder %v2514_v2, 0.0 }
 0x152   :  { %v760_v57 = vpack.c.bf16 %v696_v54, %v696_v54  ;;  %v1138_v54 = vld [vmem:[%s2862_s2 + $0x20] sm:$0xf] }
 0x154   :  { %v1057_v3 = vunpack.c.l.b16 %v760_v57 }
 0x156   :  { %v446_v55 = vpop.f32.mrf.mxu0 }
 0x157   :  { %vm569_vm2 = vcmp.ge.f32.partialorder %v446_v55, 0.0  ;;  %v633_v56 = vmul.f32 0.2, %v446_v55 }
 0x159   :  { %v697_v59 = vsel %vm569_vm2, %v446_v55, %v633_v56  ;;  %v1224_v55 = vld [vmem:[%s2862_s2 + $0x28] sm:$0xf]  ;;  %vm595_vm2 = vcmp.ge.f32.partialorder %v2523_v10, 0.0 }
 0x15a   :  { %v761_v62 = vpack.c.bf16 %v697_v59, %v697_v59  ;;  %v1242_v59 = vsel %vm819_vm1, %v1224_v55, 0 }
 0x15b   :  { %1251 = vmatpush.bf16.msra.mxu2 %v1242_v59 }
 0x15c   :  { %v1058_v4 = vunpack.c.l.b16 %v761_v62 }
 0x15e   :  { %v1061_v6 = vpack.c.b16 %v1058_v4, %v1057_v3  ;;  %v449_v8 = vpop.f32.mrf.mxu0 }
 0x15f   :  { %v634_v9 = vmul.f32 0.2, %v449_v8  ;;  %vm570_vm3 = vcmp.ge.f32.partialorder %v449_v8, 0.0 }
 0x160   :  { %2135 = vmatmul.msk.bf16.vlgmr.msrb.gmra.mxu1 %vm812_vm4, %v1061_v6  ;;  %v1181_v6 = vld [vmem:[%s2862_s2 + $0x24] sm:$0xf] }
 0x161   :  { %v698_v14 = vsel %vm570_vm3, %v449_v8, %v634_v9 }
 0x162   :  { %v762_v18 = vpack.c.bf16 %v698_v14, %v698_v14 }
 0x163   :  { %v909_v12 = vpop.f32.mrf.mxu3 }
 0x164   :  { %v919_v13 = vadd.f32 %v909_v12, %v871_v20  ;;  %v1059_v30 = vunpack.c.l.b16 %v762_v18  ;;  %v2600_v20 = vpop.f32.mrf.mxu1  ;;  %v1199_v12 = vsel %vm819_vm1, %v1181_v6, 0  ;;  %v650_v6 = vmul.f32 0.2, %v2521_v7 }
 0x165   :  { %1208 = vmatpush.bf16.msra.mxu1 %v1199_v12 }
 0x166   :  { %v451_v16 = vpop.f32.mrf.mxu0 }
 0x167   :  { %vm571_vm5 = vcmp.ge.f32.partialorder %v451_v16, 0.0  ;;  %v635_v17 = vmul.f32 0.2, %v451_v16 }
 0x169   :  { %v699_v19 = vsel %vm571_vm5, %v451_v16, %v635_v17 }
 0x16a   :  { %v763_v22 = vpack.c.bf16 %v699_v19, %v699_v19 }
 0x16b   :  { %v2597_v25 = vpop.f32.mrf.mxu3 }
 0x16c   :  { %v1060_v33 = vunpack.c.l.b16 %v763_v22 }
 0x16e   :  { %v454_v35 = vpop.f32.mrf.mxu0  ;;  %v1062_v36 = vpack.c.b16 %v1060_v33, %v1059_v30  ;;  %v648_v30 = vmul.f32 0.2, %v2504_v51  ;;  %v649_v33 = vmul.f32 0.2, %v2508_v58 }
 0x16f   :  { %v636_v37 = vmul.f32 0.2, %v454_v35  ;;  %vm572_vm6 = vcmp.ge.f32.partialorder %v454_v35, 0.0 }
 0x170   :  { %2136 = vmatmul.msk.bf16.gmra.mxu1 %vm812_vm4, %v1062_v36 }
 0x171   :  { %v700_v41 = vsel %vm572_vm6, %v454_v35, %v636_v37  ;;  %vm596_vm6 = vcmp.ge.f32.partialorder %v2531_v21, 0.0 }
 0x172   :  { %v764_v47 = vpack.c.bf16 %v700_v41, %v700_v41  ;;  %v712_v41 = vsel %vm584_vm10, %v2504_v51, %v648_v30  ;;  %v1267_v51 = vld [vmem:[%s2862_s2 + $0x2c] sm:$0xf] }
 0x173   :  { %v914_v38 = vpop.f32.mrf.mxu3 }
 0x174   :  { %v921_v39 = vadd.f32 %v914_v38, %v876_v46  ;;  %v1100_v56 = vunpack.c.l.b16 %v764_v47  ;;  %v1156_v46 = vsel %vm819_vm1, %v1138_v54, 0  ;;  %v776_v47 = vpack.c.bf16 %v712_v41, %v712_v41  ;;  %v1310_v41 = vld [vmem:[%s2862_s2 + $0x30] sm:$0xf] }
 0x175   :  { %1165 = vmatpush.bf16.msrb.mxu3 %v1156_v46 }
 0x176   :  { %v456_v42 = vpop.f32.mrf.mxu0 }
 0x177   :  { %vm573_vm7 = vcmp.ge.f32.partialorder %v456_v42, 0.0  ;;  %v637_v44 = vmul.f32 0.2, %v456_v42 }
 0x179   :  { %v701_v48 = vsel %vm573_vm7, %v456_v42, %v637_v44  ;;  %v713_v42 = vsel %vm585_vm11, %v2508_v58, %v649_v33  ;;  %vm588_vm7 = vcmp.ge.f32.partialorder %v2536_v28, 0.0 }
 0x17a   :  { %v765_v52 = vpack.c.bf16 %v701_v48, %v701_v48  ;;  %v777_v48 = vpack.c.bf16 %v713_v42, %v713_v42 }
 0x17c   :  { %v1101_v57 = vunpack.c.l.b16 %v765_v52 }
 0x17d   :  { %v952_v62 = vpop.f32.mrf.mxu1 }
 0x17e   :  { %v1104_v1 = vpack.c.b16 %v1101_v57, %v1100_v56  ;;  %v2610_v3 = vadd.f32 %v952_v62, %v919_v13  ;;  %v459_v4 = vpop.f32.mrf.mxu0  ;;  %v1229_v56 = vunpack.c.l.b16 %v776_v47  ;;  %v1230_v57 = vunpack.c.l.b16 %v777_v48  ;;  %v2628_v62 = vpop.f32.mrf.mxu2 }
 0x17f   :  { %v638_v5 = vmul.f32 0.2, %v459_v4  ;;  %vm574_vm8 = vcmp.ge.f32.partialorder %v459_v4, 0.0 }
 0x180   :  { %2137 = vmatmul.msk.bf16.vlgmr.msrb.gmra.mxu2 %vm812_vm4, %v1104_v1  ;;  %v1233_v58 = vpack.c.b16 %v1230_v57, %v1229_v56 }
 0x181   :  { %v702_v8 = vsel %vm574_vm8, %v459_v4, %v638_v5  ;;  %v1285_v5 = vsel %vm819_vm1, %v1267_v51, 0  ;;  %v660_v51 = vmul.f32 0.2, %v2531_v21  ;;  %vm589_vm8 = vcmp.ge.f32.partialorder %v2549_v43, 0.0 }
 0x182   :  { %v766_v13 = vpack.c.bf16 %v702_v8, %v702_v8  ;;  %v651_v8 = vmul.f32 0.2, %v2525_v15  ;;  %1294 = vmatpush.bf16.msra.mxu3 %v1285_v5 }
 0x184   :  { %v1102_v19 = vunpack.c.l.b16 %v766_v13  ;;  %v659_v13 = vmul.f32 0.2, %v2523_v10 }
 0x185   :  { %v2616_v9 = vpop.f32.mrf.mxu1 }
 0x186   :  { %v461_v14 = vpop.f32.mrf.mxu0  ;;  %v723_v33 = vsel %vm595_vm2, %v2523_v10, %v659_v13 }
 0x187   :  { %vm575_vm9 = vcmp.ge.f32.partialorder %v461_v14, 0.0  ;;  %v639_v16 = vmul.f32 0.2, %v461_v14  ;;  %v787_v47 = vpack.c.bf16 %v723_v33, %v723_v33 }
 0x189   :  { %v703_v17 = vsel %vm575_vm9, %v461_v14, %v639_v16  ;;  %v658_v16 = vmul.f32 0.2, %v2514_v2  ;;  %v2657_v56 = vunpack.c.l.b16 %v787_v47  ;;  %vm597_vm9 = vcmp.ge.f32.partialorder %v2538_v34, 0.0 }
 0x18a   :  { %v767_v18 = vpack.c.bf16 %v703_v17, %v703_v17  ;;  %v714_v17 = vsel %vm586_vm14, %v2521_v7, %v650_v6  ;;  %v1328_v7 = vsel %vm819_vm1, %v1310_v41, 0  ;;  %vm598_vm14 = vcmp.ge.f32.partialorder %v2553_v45, 0.0 }
 0x18b   :  { %1337 = vmatpush.bf16.msrb.mxu1 %v1328_v7 }
 0x18c   :  { %v1103_v22 = vunpack.c.l.b16 %v767_v18  ;;  %v715_v18 = vsel %vm587_vm15, %v2525_v15, %v651_v8  ;;  %vm599_vm15 = vcmp.ge.f32.partialorder %v2562_v61, 0.0 }
 0x18d   :  { %v957_v35 = vpop.f32.mrf.mxu1 }
 0x18e   :  { %v2623_v36 = vadd.f32 %v957_v35, %v921_v39  ;;  %v464_v37 = vpop.f32.mrf.mxu0  ;;  %v1105_v38 = vpack.c.b16 %v1103_v22, %v1102_v19  ;;  %v722_v22 = vsel %vm594_vm0, %v2514_v2, %v658_v16  ;;  %v778_v35 = vpack.c.bf16 %v714_v17, %v714_v17 }
 0x18f   :  { %v640_v44 = vmul.f32 0.2, %v464_v37  ;;  %vm576_vm12 = vcmp.ge.f32.partialorder %v464_v37, 0.0 }
 0x190   :  { %2138 = vmatmul.msk.bf16.gmra.mxu2 %vm812_vm4, %v1105_v38  ;;  %v1231_v48 = vunpack.c.l.b16 %v778_v35  ;;  %v1353_v35 = vld [vmem:[%s2862_s2 + $0x34] sm:$0xf] }
 0x191   :  { %v704_v52 = vsel %vm576_vm12, %v464_v37, %v640_v44  ;;  %v779_v37 = vpack.c.bf16 %v715_v18, %v715_v18  ;;  %v786_v44 = vpack.c.bf16 %v722_v22, %v722_v22  ;;  %vm590_vm12 = vcmp.ge.f32.partialorder %v2557_v53, 0.0 }
 0x192   :  { %v768_v39 = vpack.c.bf16 %v704_v52, %v704_v52 }
 0x193   :  { %v1232_v52 = vunpack.c.l.b16 %v779_v37 }
 0x194   :  { %v1143_v1 = vunpack.c.l.b16 %v768_v39 }
 0x196   :  { %v466_v54 = vpop.f32.mrf.mxu0 }
 0x197   :  { %vm577_vm13 = vcmp.ge.f32.partialorder %v466_v54, 0.0  ;;  %v641_v55 = vmul.f32 0.2, %v466_v54 }
 0x199   :  { %v705_v46 = vsel %vm577_vm13, %v466_v54, %v641_v55  ;;  %vm591_vm13 = vcmp.ge.f32.partialorder %v2568_v0, 0.0 }
 0x19a   :  { %v769_v59 = vpack.c.bf16 %v705_v46, %v705_v46 }
 0x19c   :  { %v1144_v4 = vunpack.c.l.b16 %v769_v59  ;;  %v1234_v59 = vpack.c.b16 %v1232_v52, %v1231_v48 }
 0x19e   :  { %v1147_v12 = vpack.c.b16 %v1144_v4, %v1143_v1  ;;  %v469_v14 = vpop.f32.mrf.mxu0  ;;  %v653_v1 = vmul.f32 0.2, %v2549_v43  ;;  %v661_v4 = vmul.f32 0.2, %v2538_v34 }
 0x19f   :  { %v642_v19 = vmul.f32 0.2, %v469_v14  ;;  %vm578_vm3 = vcmp.ge.f32.partialorder %v469_v14, 0.0 }
 0x1a0   :  { %2139 = vmatmul.msk.bf16.vlgmr.msrb.gmra.mxu3 %vm812_vm4, %v1147_v12  ;;  %2143 = vmatmul.msk.bf16.vlgmr.msra.gmra.mxu2 %vm812_vm4, %v1233_v58  ;;  %v652_v58 = vmul.f32 0.2, %v2536_v28  ;;  %v724_v12 = vsel %vm596_vm6, %v2531_v21, %v660_v51  ;;  %v717_v16 = vsel %vm589_vm8, %v2549_v43, %v653_v1  ;;  %v725_v17 = vsel %vm597_vm9, %v2538_v34, %v661_v4  ;;  %v1396_v21 = vld [vmem:[%s2862_s2 + $0x38] sm:$0xf] }
 0x1a1   :  { %v706_v42 = vsel %vm578_vm3, %v469_v14, %v642_v19  ;;  %v788_v19 = vpack.c.bf16 %v724_v12, %v724_v12  ;;  %v1371_v34 = vsel %vm819_vm1, %v1353_v35, 0  ;;  %v1414_v37 = vsel %vm819_vm1, %v1396_v21, 0 }
 0x1a2   :  { %v770_v10 = vpack.c.bf16 %v706_v42, %v706_v42  ;;  %v716_v14 = vsel %vm588_vm7, %v2536_v28, %v652_v58  ;;  %v789_v28 = vpack.c.bf16 %v725_v17, %v725_v17  ;;  %1380 = vmatpush.bf16.msrb.mxu2 %v1371_v34  ;;  %1423 = vmatpush.bf16.msrb.mxu3 %v1414_v37  ;;  %v655_v51 = vmul.f32 0.2, %v2568_v0 }
 0x1a3   :  { %v995_v30 = vpop.f32.mrf.mxu2  ;;  %v780_v22 = vpack.c.bf16 %v716_v14, %v716_v14  ;;  %v663_v58 = vmul.f32 0.2, %v2562_v61  ;;  %vm601_vm3 = vcmp.ge.f32.partialorder %v2547_v40, 0.0  ;;  %vm603_vm6 = vcmp.ge.f32.partialorder %v2566_v63, 0.0 }
 0x1a4   :  { %v2649_v38 = vadd.f32 %v995_v30, %v2610_v3  ;;  %v2655_v3 = vunpack.c.l.b16 %v786_v44  ;;  %v1145_v39 = vunpack.c.l.b16 %v770_v10  ;;  %v781_v30 = vpack.c.bf16 %v717_v16, %v717_v16  ;;  %v2690_v10 = vpop.f32.mrf.mxu3 }
 0x1a5   :  { %v1272_v42 = vunpack.c.l.b16 %v780_v22  ;;  %v1358_v44 = vunpack.c.l.b16 %v788_v19  ;;  %v1359_v47 = vunpack.c.l.b16 %v789_v28  ;;  %v719_v12 = vsel %vm591_vm13, %v2568_v0, %v655_v51 }
 0x1a6   :  { %v471_v15 = vpop.f32.mrf.mxu0  ;;  %v1320_v8 = vpack.c.b16 %v2657_v56, %v2655_v3  ;;  %v1273_v7 = vunpack.c.l.b16 %v781_v30  ;;  %v727_v17 = vsel %vm599_vm15, %v2562_v61, %v663_v58  ;;  %v783_v22 = vpack.c.bf16 %v719_v12, %v719_v12 }
 0x1a7   :  { %vm579_vm5 = vcmp.ge.f32.partialorder %v471_v15, 0.0  ;;  %v643_v2 = vmul.f32 0.2, %v471_v15  ;;  %v666_v12 = vmul.f32 0.2, %v2555_v49  ;;  %vm604_vm7 = vcmp.ge.f32.partialorder %v2570_v11, 0.0 }
 0x1a8   :  { %v1276_v52 = vpack.c.b16 %v1273_v7, %v1272_v42  ;;  %v1275_v37 = vunpack.c.l.b16 %v783_v22  ;;  %vm605_vm8 = vcmp.ge.f32.partialorder %v2585_v32, 0.0  ;;  %vm606_vm9 = vcmp.ge.f32.partialorder %v2587_v50, 0.0 }
 0x1a9   :  { %v707_v54 = vsel %vm579_vm5, %v471_v15, %v643_v2  ;;  %vm602_vm5 = vcmp.ge.f32.partialorder %v2555_v49, 0.0  ;;  %vm1929_vm15 = vcmask 254976  }
 0x1aa   :  { %v771_v55 = vpack.c.bf16 %v707_v54, %v707_v54 }
 0x1ab   :  { %v2659_v57 = vpop.f32.mrf.mxu2 }
 0x1ac   :  { %v1146_v46 = vunpack.c.l.b16 %v771_v55 }
 0x1ae   :  { %v474_v5 = vpop.f32.mrf.mxu0  ;;  %v1148_v6 = vpack.c.b16 %v1146_v46, %v1145_v39  ;;  %v1362_v39 = vpack.c.b16 %v1359_v47, %v1358_v44  ;;  %v662_v46 = vmul.f32 0.2, %v2553_v45 }
 0x1af   :  { %v644_v13 = vmul.f32 0.2, %v474_v5  ;;  %vm580_vm10 = vcmp.ge.f32.partialorder %v474_v5, 0.0 }
 0x1b0   :  { %2140 = vmatmul.msk.bf16.gmra.mxu3 %vm812_vm4, %v1148_v6  ;;  %2144 = vmatmul.msk.bf16.gmra.mxu2 %vm812_vm4, %v1234_v59  ;;  %v654_v59 = vmul.f32 0.2, %v2557_v53 }
 0x1b1   :  { %v708_v43 = vsel %vm580_vm10, %v474_v5, %v644_v13  ;;  %v1439_v5 = vld [vmem:[%s2862_s2 + $0x3c] sm:$0xf]  ;;  %v726_v13 = vsel %vm598_vm14, %v2553_v45, %v662_v46  ;;  %v959_v46 = vpop.f32.mrf.mxu1  ;;  %vm607_vm10 = vcmp.ge.f32.partialorder %v2590_v60, 0.0 }
 0x1b2   :  { %v772_v15 = vpack.c.bf16 %v708_v43, %v708_v43  ;;  %v718_v6 = vsel %vm590_vm12, %v2557_v53, %v654_v59  ;;  %v1457_v16 = vsel %vm819_vm1, %v1439_v5, 0  ;;  %v790_v35 = vpack.c.bf16 %v726_v13, %v726_v13 }
 0x1b3   :  { %v1000_v18 = vpop.f32.mrf.mxu2  ;;  %v782_v19 = vpack.c.bf16 %v718_v6, %v718_v6  ;;  %v791_v53 = vpack.c.bf16 %v727_v17, %v727_v17  ;;  %vm600_vm1 = vcmp.ge.f32.partialorder %v2534_v24, 0.0 }
 0x1b4   :  { %v2680_v33 = vadd.f32 %v1000_v18, %v2623_v36  ;;  %v1186_v54 = vunpack.c.l.b16 %v772_v15 }
 0x1b5   :  { %v1274_v43 = vunpack.c.l.b16 %v782_v19  ;;  %v1361_v45 = vunpack.c.l.b16 %v791_v53 }
 0x1b6   :  { %v476_v41 = vpop.f32.mrf.mxu0 }
 0x1b7   :  { %vm581_vm11 = vcmp.ge.f32.partialorder %v476_v41, 0.0  ;;  %v645_v36 = vmul.f32 0.2, %v476_v41  ;;  %v1277_v44 = vpack.c.b16 %v1275_v37, %v1274_v43  ;;  %v670_v43 = vmul.f32 0.2, %v2587_v50 }
 0x1b9   :  { %v709_v2 = vsel %vm581_vm11, %v476_v41, %v645_v36  ;;  %v1360_v41 = vunpack.c.l.b16 %v790_v35  ;;  %v668_v35 = vmul.f32 0.2, %v2570_v11  ;;  %vm1520_vm11 = vcmask 130048  }
 0x1ba   :  { %v773_v48 = vpack.c.bf16 %v709_v2, %v709_v2  ;;  %v664_v2 = vmul.f32 0.2, %v2534_v24 }
 0x1bb   :  { %v1363_v47 = vpack.c.b16 %v1361_v45, %v1360_v41  ;;  %v732_v26 = vsel %vm604_vm7, %v2570_v11, %v668_v35  ;;  %v734_v11 = vsel %vm606_vm9, %v2587_v50, %v670_v43 }
 0x1bc   :  { %v1187_v55 = vunpack.c.l.b16 %v773_v48  ;;  %v665_v48 = vmul.f32 0.2, %v2547_v40  ;;  %v798_v56 = vpack.c.bf16 %v734_v11, %v734_v11 }
 0x1be   :  { %v1190_v1 = vpack.c.b16 %v1187_v55, %v1186_v54  ;;  %v479_v4 = vpop.f32.mrf.mxu0  ;;  %v729_v54 = vsel %vm601_vm3, %v2547_v40, %v665_v48  ;;  %v1446_v37 = vunpack.c.l.b16 %v798_v56  ;;  %v2273_v56 = vld [vmem:[%s2863_s3 + $0x10] sm:$0xff] }
 0x1bf   :  { %v646_v14 = vmul.f32 0.2, %v479_v4  ;;  %vm582_vm0 = vcmp.ge.f32.partialorder %v479_v4, 0.0  ;;  %v793_v51 = vpack.c.bf16 %v729_v54, %v729_v54 }
 0x1c0   :  { %2141 = vmatmul.msk.bf16.vlgmr.msra.gmra.mxu1 %vm812_vm4, %v1190_v1  ;;  %2145 = vmatmul.msk.bf16.vlgmr.msra.gmra.mxu3 %vm812_vm4, %v1276_v52  ;;  %v728_v52 = vsel %vm600_vm1, %v2534_v24, %v664_v2  ;;  %v730_v24 = vsel %vm602_vm5, %v2555_v49, %v666_v12  ;;  %v796_v49 = vpack.c.bf16 %v732_v26, %v732_v26 }
 0x1c1   :  { %2149 = vmatmul.msk.bf16.vlgmr.msrb.gmra.mxu2 %vm812_vm4, %v1362_v39  ;;  %1466 = vmatpush.bf16.msra.mxu1 %v1457_v16  ;;  %v710_v21 = vsel %vm582_vm0, %v479_v4, %v646_v14  ;;  %v792_v59 = vpack.c.bf16 %v728_v52, %v728_v52  ;;  %v1402_v1 = vunpack.c.l.b16 %v793_v51  ;;  %v667_v14 = vmul.f32 0.2, %v2566_v63 }
 0x1c2   :  { %v774_v34 = vpack.c.bf16 %v710_v21, %v710_v21  ;;  %v794_v16 = vpack.c.bf16 %v730_v24, %v730_v24  ;;  %v1444_v53 = vunpack.c.l.b16 %v796_v49 }
 0x1c3   :  { %v1038_v18 = vpop.f32.mrf.mxu3  ;;  %v1401_v58 = vunpack.c.l.b16 %v792_v59  ;;  %v731_v40 = vsel %vm603_vm6, %v2566_v63, %v667_v14 }
 0x1c4   :  { %v1048_v30 = vadd.f32 %v1038_v18, %v2649_v38  ;;  %v1188_v7 = vunpack.c.l.b16 %v774_v34  ;;  %v795_v13 = vpack.c.bf16 %v731_v40, %v731_v40  ;;  %v1403_v17 = vunpack.c.l.b16 %v794_v16 }
 0x1c5   :  { %v1405_v5 = vpack.c.b16 %v1402_v1, %v1401_v58  ;;  %v671_v34 = vmul.f32 0.2, %v2590_v60 }
 0x1c6   :  { %v481_v0 = vpop.f32.mrf.mxu0  ;;  %v1404_v18 = vunpack.c.l.b16 %v795_v13 }
 0x1c7   :  { %vm583_vm2 = vcmp.ge.f32.partialorder %v481_v0, 0.0  ;;  %v647_v28 = vmul.f32 0.2, %v481_v0 }
 0x1c9   :  { %v711_v36 = vsel %vm583_vm2, %v481_v0, %v647_v28  ;;  %v1002_v0 = vpop.f32.mrf.mxu2 }
 0x1ca   :  { %v775_v61 = vpack.c.bf16 %v711_v36, %v711_v36 }
 0x1cb   :  { %v2712_v42 = vpop.f32.mrf.mxu3 }
 0x1cc   :  { %v1189_v15 = vunpack.c.l.b16 %v775_v61 }
 0x1ce   :  { %v1191_v38 = vpack.c.b16 %v1189_v15, %v1188_v7 }
 0x1d0   :  { %2142 = vmatmul.msk.bf16.gmra.mxu1 %vm812_vm4, %v1191_v38  ;;  %2146 = vmatmul.msk.bf16.gmra.mxu3 %vm812_vm4, %v1277_v44  ;;  %v878_v38 = vadd.f32 %v2628_v62, %v2600_v20  ;;  %v2272_v20 = vld [vmem:[%s2863_s3 + $0x8] sm:$0xff]  ;;  %v2271_v62 = vld [vmem:[%s2863_s3] sm:$0xff] }
 0x1d1   :  { %2150 = vmatmul.msk.bf16.gmra.mxu2 %vm812_vm4, %v1363_v47  ;;  %1553 = vmatpush.bf16.msra.mxu3 %v2271_v62 }
 0x1d2   :  { %v922_v50 = vadd.f32 %v2690_v10, %v878_v38  ;;  %1531 = vmatpush.bf16.msra.mxu2 %v2272_v20  ;;  %v2276_v20 = vld [vmem:[%s2863_s3 + $0x28] sm:$0xff] }
 0x1d3   :  { %v1043_v55 = vpop.f32.mrf.mxu3 }
 0x1d4   :  { %v1050_v39 = vadd.f32 %v1043_v55, %v2680_v33 }
 0x1d6   :  { %1578 = vmatpush.bf16.msrb.mxu2 %v2273_v56 }
 0x1db   :  { %v1045_v15 = vpop.f32.mrf.mxu3 }
 0x1dd   :  { %v1081_v4 = vpop.f32.mrf.mxu1 }
 0x1de   :  { %v2724_v6 = vadd.f32 %v1081_v4, %v1048_v30  ;;  %v1406_v30 = vpack.c.b16 %v1404_v18, %v1403_v17 }
 0x1e0   :  { %2147 = vmatmul.msk.bf16.vlgmr.msrb.gmra.mxu1 %vm812_vm4, %v1319_v27  ;;  %2151 = vmatmul.msk.bf16.vlgmr.msrb.gmra.mxu3 %vm812_vm4, %v1405_v5  ;;  %v733_v27 = vsel %vm605_vm8, %v2585_v32, %v669_v23  ;;  %v735_v32 = vsel %vm607_vm10, %v2590_v60, %v671_v34  ;;  %v965_v60 = vadd.f32 %v959_v46, %v922_v50 }
 0x1e1   :  { %v797_v63 = vpack.c.bf16 %v733_v27, %v733_v27  ;;  %v2275_v27 = vld [vmem:[%s2863_s3 + $0x20] sm:$0xff] }
 0x1e2   :  { %v1008_v48 = vadd.f32 %v1002_v0, %v965_v60  ;;  %1629 = vmatpush.bf16.msrb.mxu1 %v2275_v27 }
 0x1e3   :  { %v1445_v21 = vunpack.c.l.b16 %v797_v63 }
 0x1e4   :  { %v1051_v55 = vadd.f32 %v1045_v15, %v1008_v48 }
 0x1e5   :  { %v2737_v33 = vpop.f32.mrf.mxu1  ;;  %v1448_v28 = vpack.c.b16 %v1445_v21, %v1444_v53 }
 0x1ed   :  { %v1086_v19 = vpop.f32.mrf.mxu1 }
 0x1ee   :  { %v1093_v22 = vadd.f32 %v1086_v19, %v1050_v39 }
 0x1f0   :  { %2148 = vmatmul.msk.bf16.gmra.mxu1 %vm812_vm4, %v1320_v8  ;;  %2152 = vmatmul.msk.bf16.gmra.mxu3 %vm812_vm4, %v1406_v30  ;;  %v799_v8 = vpack.c.bf16 %v735_v32, %v735_v32  ;;  %v873_v30 = vadd.f32 %v2581_v29, %v2583_v31 }
 0x1f2   :  { %v1447_v41 = vunpack.c.l.b16 %v799_v8  ;;  %v920_v35 = vadd.f32 %v2597_v25, %v873_v30 }
 0x1f4   :  { %v1449_v36 = vpack.c.b16 %v1447_v41, %v1446_v37  ;;  %v963_v23 = vadd.f32 %v2616_v9, %v920_v35  ;;  %v2278_v37 = vld [vmem:[%s2863_s3 + $0x38] sm:$0xff] }
 0x1f5   :  { %v1088_v54 = vpop.f32.mrf.mxu1 }
 0x1f6   :  { %v1094_v59 = vadd.f32 %v1088_v54, %v1051_v55  ;;  %v1006_v49 = vadd.f32 %v2659_v57, %v963_v23 }
 0x1f8   :  { %v1049_v0 = vadd.f32 %v2712_v42, %v1006_v49 }
 0x1fa   :  { %v1092_v25 = vadd.f32 %v2737_v33, %v1049_v0  ;;  %v2279_v0 = vld [vmem:[%s2863_s3 + $0x40] sm:$0xff] }
 0x200   :  { %2153 = vmatmul.msk.bf16.vlgmr.msra.gmra.mxu1 %vm812_vm4, %v1448_v28  ;;  %v2274_v28 = vld [vmem:[%s2863_s3 + $0x18] sm:$0xff] }
 0x201   :  { %1604 = vmatpush.bf16.msrb.mxu3 %v2274_v28  ;;  %1710 = vmatpush.bf16.msra.mxu1 %v2278_v37 }
 0x203   :  { %v1124_v3 = vpop.f32.mrf.mxu2 }
 0x204   :  { %v1134_v26 = vadd.f32 %v1124_v3, %v2724_v6 }
 0x20b   :  { %v1126_v45 = vpop.f32.mrf.mxu2 }
 0x20c   :  { %v1135_v9 = vadd.f32 %v1126_v45, %v1092_v25 }
 0x210   :  { %2154 = vmatmul.msk.bf16.gmra.mxu1 %vm812_vm4, %v1449_v36  ;;  %v2800_v36 = vld [vmem:[%s2864_s4] ss:$0 sm:$0xff] }
 0x213   :  { %v1129_v61 = vpop.f32.mrf.mxu2 }
 0x214   :  { %v1136_v7 = vadd.f32 %v1129_v61, %v1093_v22 }
 0x21b   :  { %v1131_v39 = vpop.f32.mrf.mxu2 }
 0x21c   :  { %v1137_v51 = vadd.f32 %v1131_v39, %v1094_v59 }
 0x223   :  { %v1167_v44 = vpop.f32.mrf.mxu3  ;;  %v1253_v46 = vpop.f32.mrf.mxu2 }
 0x224   :  { %v1177_v63 = vadd.f32 %v1167_v44, %v1134_v26 }
 0x22b   :  { %v1169_v47 = vpop.f32.mrf.mxu3  ;;  %v1255_v13 = vpop.f32.mrf.mxu2 }
 0x22c   :  { %v1178_v43 = vadd.f32 %v1169_v47, %v1135_v9 }
 0x233   :  { %v1172_v2 = vpop.f32.mrf.mxu3  ;;  %v1258_v19 = vpop.f32.mrf.mxu2 }
 0x234   :  { %v1179_v52 = vadd.f32 %v1172_v2, %v1136_v7 }
 0x23b   :  { %v1174_v58 = vpop.f32.mrf.mxu3  ;;  %v2783_v31 = vpop.f32.mrf.mxu2 }
 0x23c   :  { %v1180_v1 = vadd.f32 %v1174_v58, %v1137_v51 }
 0x23d   :  { %v1210_v4 = vpop.f32.mrf.mxu1 }
 0x23e   :  { %v1220_v29 = vadd.f32 %v1210_v4, %v1177_v63 }
 0x240   :  { %v1263_v6 = vadd.f32 %v1253_v46, %v1220_v29 }
 0x243   :  { %v1296_v10 = vpop.f32.mrf.mxu3 }
 0x244   :  { %v1306_v57 = vadd.f32 %v1296_v10, %v1263_v6  ;;  %v1382_v3 = vpop.f32.mrf.mxu2 }
 0x245   :  { %v1212_v5 = vpop.f32.mrf.mxu1 }
 0x246   :  { %v1221_v11 = vadd.f32 %v1212_v5, %v1178_v43 }
 0x248   :  { %v1264_v33 = vadd.f32 %v1255_v13, %v1221_v11  ;;  %v2283_v11 = vld [vmem:[%s2863_s3 + $0x60] sm:$0xff] }
 0x24b   :  { %v1298_v16 = vpop.f32.mrf.mxu3 }
 0x24c   :  { %v1307_v41 = vadd.f32 %v1298_v16, %v1264_v33  ;;  %v1384_v47 = vpop.f32.mrf.mxu2 }
 0x24d   :  { %v1215_v12 = vpop.f32.mrf.mxu1 }
 0x24e   :  { %v2761_v14 = vadd.f32 %v1215_v12, %v1179_v52  ;;  %v2277_v52 = vld [vmem:[%s2863_s3 + $0x30] sm:$0xff] }
 0x250   :  { %v1265_v39 = vadd.f32 %v1258_v19, %v2761_v14  ;;  %v2281_v14 = vld [vmem:[%s2863_s3 + $0x50] sm:$0xff] }
 0x253   :  { %v1301_v18 = vpop.f32.mrf.mxu3 }
 0x254   :  { %v1308_v58 = vadd.f32 %v1301_v18, %v1265_v39  ;;  %v1387_v46 = vpop.f32.mrf.mxu2 }
 0x255   :  { %v1217_v24 = vpop.f32.mrf.mxu1 }
 0x256   :  { %v2769_v40 = vadd.f32 %v1217_v24, %v1180_v1 }
 0x258   :  { %v1266_v23 = vadd.f32 %v2783_v31, %v2769_v40  ;;  %v2284_v40 = vld [vmem:[%s2863_s3 + $0x68] sm:$0xff] }
 0x25b   :  { %v2780_v53 = vpop.f32.mrf.mxu3 }
 0x25c   :  { %v1309_v27 = vadd.f32 %v2780_v53, %v1266_v23  ;;  %v1389_v31 = vpop.f32.mrf.mxu2 }
 0x25d   :  { %v1339_v17 = vpop.f32.mrf.mxu1 }
 0x25e   :  { %v1349_v32 = vadd.f32 %v1339_v17, %v1306_v57 }
 0x260   :  { %v1392_v8 = vadd.f32 %v1382_v3, %v1349_v32 }
 0x263   :  { %v1425_v42 = vpop.f32.mrf.mxu3 }
 0x264   :  { %v1435_v45 = vadd.f32 %v1425_v42, %v1392_v8  ;;  %v2282_v8 = vld [vmem:[%s2863_s3 + $0x58] sm:$0xff] }
 0x265   :  { %v1341_v22 = vpop.f32.mrf.mxu1 }
 0x266   :  { %v1350_v7 = vadd.f32 %v1341_v22, %v1307_v41  ;;  %v2280_v22 = vld [vmem:[%s2863_s3 + $0x48] sm:$0xff] }
 0x268   :  { %v1393_v50 = vadd.f32 %v1384_v47, %v1350_v7  ;;  %v2285_v47 = vld [vmem:[%s2863_s3 + $0x70] sm:$0xff] }
 0x26b   :  { %v1427_v38 = vpop.f32.mrf.mxu3 }
 0x26c   :  { %v1436_v2 = vadd.f32 %v1427_v38, %v1393_v50 }
 0x26d   :  { %v1344_v21 = vpop.f32.mrf.mxu1 }
 0x26e   :  { %v1351_v5 = vadd.f32 %v1344_v21, %v1308_v58 }
 0x270   :  { %v1394_v13 = vadd.f32 %v1387_v46, %v1351_v5 }
 0x273   :  { %v1430_v24 = vpop.f32.mrf.mxu3 }
 0x274   :  { %v1437_v18 = vadd.f32 %v1430_v24, %v1394_v13 }
 0x275   :  { %v2789_v34 = vpop.f32.mrf.mxu1 }
 0x276   :  { %v1352_v63 = vadd.f32 %v2789_v34, %v1309_v27 }
 0x278   :  { %v1395_v53 = vadd.f32 %v1389_v31, %v1352_v63 }
 0x27b   :  { %v1432_v25 = vpop.f32.mrf.mxu3 }
 0x27c   :  { %v1438_v43 = vadd.f32 %v1432_v25, %v1395_v53 }
 0x27d   :  { %v1468_v61 = vpop.f32.mrf.mxu1 }
 0x27e   :  { %v1478_v15 = vadd.f32 %v1468_v61, %v1435_v45 }
 0x280   :  { %v1486_v44 = vadd.f32 %v2800_v36, %v1478_v15 }
 0x282   :  { %vm1490_vm4 = vcmp.ge.f32.partialorder %v1486_v44, 0.0  ;;  %v1494_v60 = vmul.f32 0.2, %v1486_v44 }
 0x284   :  { %v1498_v48 = vsel %vm1490_vm4, %v1486_v44, %v1494_v60 }
 0x285   :  { %v1502_v54 = vpack.c.bf16 %v1498_v48, %v1498_v48  ;;  %v1470_v55 = vpop.f32.mrf.mxu1 }
 0x286   :  { %v1479_v59 = vadd.f32 %v1470_v55, %v1436_v2 }
 0x287   :  { %v1511_v51 = vunpack.c.l.b16 %v1502_v54  ;;  %2164 = vmatmul.msk.bf16.vlgmr.msra.gmra.mxu3 %vm1520_vm11, %v1502_v54 }
 0x288   :  { %v1487_v1 = vadd.f32 %v2800_v36, %v1479_v59  ;;  %1684 = vmatpush.bf16.msra.mxu3 %v2277_v52 }
 0x289   :  { %v1512_v4 = vpack.c.b16 %v1511_v51, %v1511_v51 }
 0x28a   :  { %vm1491_vm12 = vcmp.ge.f32.partialorder %v1487_v1, 0.0  ;;  %v1495_v12 = vmul.f32 0.2, %v1487_v1 }
 0x28b   :  { %v1513_v62 = vrot.slane %v1512_v4, 1  ;;  %v1587_v30 = vrot.slane %v1512_v4, 3  ;;  %v1561_v29 = vrot.slane %v1512_v4, 2 }
 0x28c   :  { %v1499_v10 = vsel %vm1491_vm12, %v1487_v1, %v1495_v12 }
 0x28d   :  { %v1503_v16 = vpack.c.bf16 %v1499_v10, %v1499_v10  ;;  %2159 = vmatmul.msk.bf16.vlgmr.msra.gmra.mxu2 %vm1520_vm11, %v1513_v62  ;;  %v1473_v17 = vpop.f32.mrf.mxu1 }
 0x28e   :  { %1658 = vmatpush.bf16.msra.mxu2 %v2276_v20  ;;  %v1480_v19 = vadd.f32 %v1473_v17, %v1437_v18 }
 0x28f   :  { %2179 = vmatmul.msk.bf16.vlgmr.msrb.gmra.mxu1 %vm1520_vm11, %v1503_v16  ;;  %v1639_v35 = vunpack.c.l.b16 %v1503_v16 }
 0x290   :  { %1790 = vmatpush.bf16.msrb.mxu1 %v2281_v14  ;;  %v1488_v26 = vadd.f32 %v2800_v36, %v1480_v19 }
 0x291   :  { %v1640_v49 = vpack.c.b16 %v1639_v35, %v1639_v35 }
 0x292   :  { %v1496_v21 = vmul.f32 0.2, %v1488_v26  ;;  %vm1492_vm13 = vcmp.ge.f32.partialorder %v1488_v26, 0.0 }
 0x293   :  { %v1693_v9 = vrot.slane %v1640_v49, 3  ;;  %v1667_v32 = vrot.slane %v1640_v49, 2  ;;  %v1641_v37 = vrot.slane %v1640_v49, 1 }
 0x294   :  { %v1500_v6 = vsel %vm1492_vm13, %v1488_v26, %v1496_v21 }
 0x295   :  { %v1475_v28 = vpop.f32.mrf.mxu1  ;;  %v1504_v57 = vpack.c.bf16 %v1500_v6, %v1500_v6 }
 0x296   :  { %v1481_v34 = vadd.f32 %v1475_v28, %v1438_v43 }
 0x297   :  { %2174 = vmatmul.msk.bf16.vlgmr.msrb.gmra.mxu3 %vm1520_vm11, %v1587_v30  ;;  %v1745_v3 = vunpack.c.l.b16 %v1504_v57 }
 0x298   :  { %1764 = vmatpush.bf16.msrb.mxu3 %v2280_v22  ;;  %v1489_v42 = vadd.f32 %v2800_v36, %v1481_v34  ;;  %v2286_v36 = vld [vmem:[%s2863_s3 + $0x78] sm:$0xff]  ;;  %s2327_s3 = smov [#allocation2]  }
 0x299   :  { %v1746_v56 = vpack.c.b16 %v1745_v3, %v1745_v3  ;;  %s1936_s21 = sshll.u32 %s2327_s3, 4  ;;  %s1937_s21 = int_to_ptr.vmem [resolvable:$true] %s1936_s21 }
 0x29a   :  { %v1497_v33 = vmul.f32 0.2, %v1489_v42  ;;  %vm1493_vm14 = vcmp.ge.f32.partialorder %v1489_v42, 0.0 }
 0x29b   :  { %v1773_v41 = vrot.slane %v1746_v56, 2  ;;  %v1747_v7 = vrot.slane %v1746_v56, 1  ;;  %v1799_v50 = vrot.slane %v1746_v56, 3 }
 0x29c   :  { %v1501_v45 = vsel %vm1493_vm14, %v1489_v42, %v1497_v33 }
 0x29d   :  { %2169 = vmatmul.msk.bf16.vlgmr.msrb.gmra.mxu2 %vm1520_vm11, %v1561_v29  ;;  %v1505_v61 = vpack.c.bf16 %v1501_v45, %v1501_v45 }
 0x29e   :  { %1735 = vmatpush.bf16.msrb.mxu2 %v2279_v0 }
 0x29f   :  { %2194 = vmatmul.msk.bf16.vlgmr.msra.gmra.mxu1 %vm1520_vm11, %v1693_v9  ;;  %v1851_v15 = vunpack.c.l.b16 %v1505_v61 }
 0x2a0   :  { %1870 = vmatpush.bf16.msra.mxu1 %v2284_v40 }
 0x2a1   :  { %v1852_v44 = vpack.c.b16 %v1851_v15, %v1851_v15 }
 0x2a3   :  { %v1853_v38 = vrot.slane %v1852_v44, 1  ;;  %v1905_v60 = vrot.slane %v1852_v44, 3  ;;  %v1879_v2 = vrot.slane %v1852_v44, 2 }
 0x2a7   :  { %2189 = vmatmul.msk.bf16.vlgmr.msra.gmra.mxu3 %vm1520_vm11, %v1667_v32 }
 0x2a8   :  { %1841 = vmatpush.bf16.msra.mxu3 %v2283_v11 }
 0x2ad   :  { %2184 = vmatmul.msk.bf16.vlgmr.msra.gmra.mxu2 %vm1520_vm11, %v1641_v37 }
 0x2ae   :  { %1816 = vmatpush.bf16.msra.mxu2 %v2282_v8 }
 0x2af   :  { %2209 = vmatmul.msk.bf16.vlgmr.msrb.gmra.mxu1 %vm1520_vm11, %v1773_v41 }
 0x2b7   :  { %2204 = vmatmul.msk.bf16.vlgmr.msrb.gmra.mxu3 %vm1520_vm11, %v1747_v7 }
 0x2b8   :  { %1922 = vmatpush.bf16.msrb.mxu3 %v2286_v36 }
 0x2bd   :  { %2199 = vmatmul.msk.bf16.vlgmr.msrb.gmra.mxu2 %vm1520_vm11, %v1504_v57 }
 0x2be   :  { %1896 = vmatpush.bf16.msrb.mxu2 %v2285_v47 }
 0x2bf   :  { %2224 = vmatmul.msk.bf16.vlgmr.msra.gmra.mxu1 %vm1520_vm11, %v1853_v38 }
 0x2c7   :  { %2219 = vmatmul.msk.bf16.vlgmr.msra.gmra.mxu3 %vm1520_vm11, %v1505_v61 }
 0x2cd   :  { %2214 = vmatmul.msk.bf16.vlgmr.msra.gmra.mxu2 %vm1520_vm11, %v1799_v50 }
 0x2d7   :  { %2234 = vmatmul.msk.bf16.vlgmr.msrb.gmra.mxu3 %vm1520_vm11, %v1905_v60 }
 0x2dd   :  { %2229 = vmatmul.msk.bf16.vlgmr.msrb.gmra.mxu2 %vm1520_vm11, %v1879_v2 }
 0x30a   :  { %v1555_v48 = vpop.f32.mrf.mxu3 }
 0x30c   :  { %v1631_v52 = vpop.f32.mrf.mxu1 }
 0x310   :  { %v1533_v54 = vpop.f32.mrf.mxu2 }
 0x311   :  { %v1556_v24 = vadd.f32 %v1555_v48, %v1533_v54 }
 0x312   :  { %v1557_v55 = vpop.f32.mrf.mxu3 }
 0x314   :  { %v1633_v39 = vpop.f32.mrf.mxu1 }
 0x318   :  { %v1535_v59 = vpop.f32.mrf.mxu2 }
 0x31a   :  { %v1606_v51 = vpop.f32.mrf.mxu3 }
 0x31c   :  { %v1712_v58 = vpop.f32.mrf.mxu1 }
 0x320   :  { %v1580_v1 = vpop.f32.mrf.mxu2 }
 0x321   :  { %v1584_v13 = vadd.f32 %v1580_v1, %v1556_v24 }
 0x322   :  { %v1608_v4 = vpop.f32.mrf.mxu3 }
 0x323   :  { %v1610_v19 = vadd.f32 %v1606_v51, %v1584_v13 }
 0x324   :  { %v1714_v5 = vpop.f32.mrf.mxu1 }
 0x325   :  { %v1635_v30 = vadd.f32 %v1631_v52, %v1610_v19 }
 0x328   :  { %v1582_v12 = vpop.f32.mrf.mxu2 }
 0x32a   :  { %v1686_v20 = vpop.f32.mrf.mxu3 }
 0x32c   :  { %v1792_v62 = vpop.f32.mrf.mxu1 }
 0x330   :  { %v1660_v10 = vpop.f32.mrf.mxu2 }
 0x331   :  { %v1664_v23 = vadd.f32 %v1660_v10, %v1635_v30 }
 0x332   :  { %v1688_v14 = vpop.f32.mrf.mxu3 }
 0x333   :  { %v1690_v27 = vadd.f32 %v1686_v20, %v1664_v23 }
 0x334   :  { %v1794_v46 = vpop.f32.mrf.mxu1 }
 0x335   :  { %v1716_v21 = vadd.f32 %v1712_v58, %v1690_v27 }
 0x338   :  { %v1662_v16 = vpop.f32.mrf.mxu2 }
 0x33a   :  { %v1766_v17 = vpop.f32.mrf.mxu3 }
 0x33c   :  { %v1872_v18 = vpop.f32.mrf.mxu1 }
 0x340   :  { %v1737_v22 = vpop.f32.mrf.mxu2 }
 0x341   :  { %v1741_v0 = vadd.f32 %v1737_v22, %v1716_v21 }
 0x342   :  { %v1768_v35 = vpop.f32.mrf.mxu3 }
 0x343   :  { %v1770_v40 = vadd.f32 %v1766_v17, %v1741_v0 }
 0x344   :  { %v1874_v26 = vpop.f32.mrf.mxu1 }
 0x345   :  { %v1796_v25 = vadd.f32 %v1792_v62, %v1770_v40 }
 0x348   :  { %v1739_v49 = vpop.f32.mrf.mxu2 }
 0x34a   :  { %v1843_v63 = vpop.f32.mrf.mxu3 }
 0x350   :  { %v1818_v29 = vpop.f32.mrf.mxu2 }
 0x351   :  { %v1822_v9 = vadd.f32 %v1818_v29, %v1796_v25 }
 0x352   :  { %v1845_v31 = vpop.f32.mrf.mxu3 }
 0x353   :  { %v1847_v28 = vadd.f32 %v1843_v63, %v1822_v9 }
 0x355   :  { %v1876_v43 = vadd.f32 %v1872_v18, %v1847_v28 }
 0x358   :  { %v1820_v53 = vpop.f32.mrf.mxu2 }
 0x35a   :  { %v1924_v6 = vpop.f32.mrf.mxu3 }
 0x360   :  { %v1898_v57 = vpop.f32.mrf.mxu2 }
 0x361   :  { %v1902_v34 = vadd.f32 %v1898_v57, %v1876_v43 }
 0x362   :  { %v1926_v11 = vpop.f32.mrf.mxu3 }
 0x363   :  { %v1928_v32 = vadd.f32 %v1924_v6, %v1902_v34 }
 0x365   :  { %1930 = vst.msk [vmem:[#allocation2] sm:$0x3] %vm1929_vm15, %v1928_v32 }
 0x366   :  { %1941 = dma.vmem_to_hbm [thread:$0]  %s1937_s21, 32, %s1939_s24, [#allocation3]  }
 0x368   :  { %v1900_v3 = vpop.f32.mrf.mxu2 }
 0x369   :  { %2325 = dma.done.wait [#allocation3], 32  }
 0x36a   :  { %2326 = vsyncadd [#allocation3], 4294967264 }
 0x36b   :  { %1946 = vsyncpa [#allocation3], 1 }

</bundles_post_ra>
